<compile_context>
chip_gen: v6e
topology: v6e:2x2x1
jax: 0.10.0
libtpu: 0.0.40
codegen_flags: <defaults>
</compile_context>

<pallas_src>
import functools

import jax
import jax.numpy as jnp
from jax.experimental import pallas as pl
from jax.experimental.pallas import tpu as pltpu


# ----------------------------------------------------------------------------
# Pallas kernel: one time-chunk of a fused bidirectional LSTM recurrence.
# ----------------------------------------------------------------------------
def _bilstm_chunk_kernel(gxf_ref, gxr_ref, wblk_ref,
                         yf_ref, yr_ref, hn_ref, cn_ref,
                         h_sc, c_sc):
    """Fused bidirectional LSTM recurrence over one time chunk.

    gxf_ref : (Tc, B, 4H) bf16  x @ W_ih^T + b, forward dir, time chunk i
    gxr_ref : (Tc, B, 4H) bf16  same, reverse dir, time chunk (n_chunks-1-i)
    wblk_ref: (2H, 8H)    bf16  blkdiag(W_hh_f^T, W_hh_r^T)
    yf_ref  : (Tc, B, H)  f32   forward outputs for chunk i
    yr_ref  : (Tc, B, H)  f32   reverse outputs for chunk (n_chunks-1-i)
    hn_ref  : (2, B, H)   f32   final hidden (fwd, rev); written on last step
    cn_ref  : (2, B, H)   f32   final cell   (fwd, rev); written on last step
    h_sc    : (B, 2H)     f32   [h_f | h_r] carry, persists across grid steps
    c_sc    : (B, 2H)     f32   [c_f | c_r] carry, persists across grid steps
    """
    Tc, B, H4 = gxf_ref.shape
    H = H4 // 4
    step = pl.program_id(0)

    @pl.when(step == 0)
    def _():
        h_sc[...] = jnp.zeros_like(h_sc)
        c_sc[...] = jnp.zeros_like(c_sc)

    wblk = wblk_ref[...]                                 # hoisted, (2H, 8H)

    # Single-tanh gate activation constants (hoisted out of the loop):
    #   g lanes [2H, 3H): tanh(x)
    #   i/f/o lanes     : sigmoid(x) = 0.5 * (1 + tanh(x / 2))
    lane = jax.lax.broadcasted_iota(jnp.int32, (B, H4), 1)
    is_g = (lane >= 2 * H) & (lane < 3 * H)
    scale = jnp.where(is_g, 1.0, 0.5).astype(jnp.float32)   # pre- & post-mult
    shift = jnp.where(is_g, 0.0, 0.5).astype(jnp.float32)   # post-add

    def activate(gates):                                 # one tanh per tile
        return jnp.tanh(gates * scale) * scale + shift

    def cell(act, c):                                    # PyTorch order i,f,g,o
        i = act[:, 0 * H:1 * H]
        f = act[:, 1 * H:2 * H]
        g = act[:, 2 * H:3 * H]
        o = act[:, 3 * H:4 * H]
        c_new = f * c + i * g
        h_new = o * jnp.tanh(c_new)
        return h_new, c_new

    def body(t, carry):
        h_cat, c_cat = carry                             # (B, 2H) f32 each
        # ONE block-diagonal recurrent matmul serves both directions:
        # [h_f | h_r] @ blkdiag(Whh_f, Whh_r) = [h_f@Whh_f | h_r@Whh_r].
        mm = jnp.dot(h_cat.astype(jnp.bfloat16), wblk,
                     preferred_element_type=jnp.float32)          # (B, 8H)
        tr = Tc - 1 - t                                  # reverse local time
        act_f = activate(gxf_ref[t].astype(jnp.float32) + mm[:, :H4])
        act_r = activate(gxr_ref[tr].astype(jnp.float32) + mm[:, H4:])
        h_f, c_f = cell(act_f, c_cat[:, :H])
        h_r, c_r = cell(act_r, c_cat[:, H:])
        yf_ref[t] = h_f                                  # full-width stores
        yr_ref[tr] = h_r
        return (jnp.concatenate([h_f, h_r], axis=-1),
                jnp.concatenate([c_f, c_r], axis=-1))

    # Bound the unroll so long chunks don't blow the 64-vreg file.
    unroll = True if Tc <= 16 else 4
    h_cat, c_cat = jax.lax.fori_loop(0, Tc, body, (h_sc[...], c_sc[...]),
                                     unroll=unroll)
    h_sc[...] = h_cat
    c_sc[...] = c_cat

    # Final states written exactly once, on the last grid step.
    @pl.when(step == pl.num_programs(0) - 1)
    def _():
        hn_ref[0] = h_cat[:, :H]
        hn_ref[1] = h_cat[:, H:]
        cn_ref[0] = c_cat[:, :H]
        cn_ref[1] = c_cat[:, H:]


# ----------------------------------------------------------------------------
# One bidirectional LSTM layer (wrapper around the Pallas call).
# ----------------------------------------------------------------------------
def bilstm_layer(x, w_ih_f, w_hh_f, b_f, w_ih_r, w_hh_r, b_r, *, t_chunk=16):
    """x : (T, B, E_in) f32.  w_ih_* : (E_in, 4H), w_hh_* : (H, 4H)
    (pre-transposed), b_* : (1, 4H) = b_ih + b_hh.
    Returns y (T, B, 2H), h_n (2, B, H), c_n (2, B, H)  [fwd, rev]."""
    T, B, E = x.shape
    H = w_hh_f.shape[0]
    H4, H8 = 4 * H, 8 * H

    # Hoisted input projection for both directions: ONE (T*B, E) @ (E, 8H)
    # bf16 matmul with f32 accumulation, biases folded in; gx kept in bf16 to
    # halve its HBM round-trip.
    w_ih_cat = jnp.concatenate([w_ih_f, w_ih_r], axis=1).astype(jnp.bfloat16)
    b_cat = jnp.concatenate([b_f, b_r], axis=1)                    # (1, 8H) f32
    gx = jnp.dot(x.reshape(T * B, E).astype(jnp.bfloat16), w_ih_cat,
                 preferred_element_type=jnp.float32) + b_cat
    gx = gx.reshape(T, B, H8).astype(jnp.bfloat16)
    gx_f = gx[:, :, :H4]
    gx_r = gx[:, :, H4:]
    # TODO(synk): for HBM-bound sizes (esp. v5e) fuse this projection into the
    # kernel per T-chunk instead of materializing gx (T, B, 8H) in HBM.

    # Block-diagonal recurrent weight: [h_f | h_r] @ w_blk = [g_f | g_r].
    w_blk = jnp.zeros((2 * H, H8), jnp.float32)
    w_blk = w_blk.at[:H, :H4].set(w_hh_f)
    w_blk = w_blk.at[H:, H4:].set(w_hh_r)
    w_blk = w_blk.astype(jnp.bfloat16)

    # Time chunking: largest divisor of T that is <= t_chunk.  Chunk size
    # bounds per-step VMEM residency (size for v7x's 64 MiB VMEM).
    tc = max(1, min(t_chunk, T))
    while T % tc != 0:
        tc -= 1
    n_chunks = T // tc
    # TODO(synk): on v7x a leading size-2 "parallel" axis could put the two
    # directions on the two TensorCores instead of the block-diag fusion.

    y_f, y_r, h_n, c_n = pl.pallas_call(
        _bilstm_chunk_kernel,
        out_shape=(jax.ShapeDtypeStruct((T, B, H), jnp.float32),
                   jax.ShapeDtypeStruct((T, B, H), jnp.float32),
                   jax.ShapeDtypeStruct((2, B, H), jnp.float32),
                   jax.ShapeDtypeStruct((2, B, H), jnp.float32)),
        grid_spec=pltpu.PrefetchScalarGridSpec(
            num_scalar_prefetch=0,
            grid=(n_chunks,),
            in_specs=[
                pl.BlockSpec((tc, B, H4), lambda i: (i, 0, 0)),
                pl.BlockSpec((tc, B, H4),
                             lambda i: (n_chunks - 1 - i, 0, 0)),
                pl.BlockSpec((2 * H, H8), lambda i: (0, 0)),
            ],
            out_specs=(
                pl.BlockSpec((tc, B, H), lambda i: (i, 0, 0)),
                pl.BlockSpec((tc, B, H),
                             lambda i: (n_chunks - 1 - i, 0, 0)),
                pl.BlockSpec((2, B, H), lambda i: (0, 0, 0)),
                pl.BlockSpec((2, B, H), lambda i: (0, 0, 0)),
            ),
            scratch_shapes=[pltpu.VMEM((B, 2 * H), jnp.float32),
                            pltpu.VMEM((B, 2 * H), jnp.float32)]),
        compiler_params=pltpu.CompilerParams(
            dimension_semantics=("arbitrary",),   # serial: h/c carry in scratch
            vmem_limit_bytes=48 * 1024 * 1024),
    )(gx_f, gx_r, w_blk)

    y = jnp.concatenate([y_f, y_r], axis=-1)               # (T, B, 2H)
    return y, h_n, c_n


# ----------------------------------------------------------------------------
# Parameter construction (mirrors nn.Embedding / nn.LSTM / nn.Linear shapes;
# values synthetic, uniform(-1/sqrt(H), 1/sqrt(H))).
# ----------------------------------------------------------------------------
def init_params(key, vocab_size, embed_size, hidden_size, num_layers,
                output_size):
    params = {}
    k = 1.0 / jnp.sqrt(jnp.float32(hidden_size))

    def uni(key, shape):
        return jax.random.uniform(key, shape, jnp.float32, -k, k)

    keys = jax.random.split(key, 3 + 4 * num_layers * 2)
    params["embedding"] = jax.random.normal(
        keys[0], (vocab_size, embed_size), jnp.float32)

    idx = 1
    for l in range(num_layers):
        in_size = embed_size if l == 0 else 2 * hidden_size
        for suffix in ["", "_reverse"]:
            w_ih = uni(keys[idx], (4 * hidden_size, in_size)); idx += 1
            w_hh = uni(keys[idx], (4 * hidden_size, hidden_size)); idx += 1
            b_ih = uni(keys[idx], (4 * hidden_size,)); idx += 1
            b_hh = uni(keys[idx], (4 * hidden_size,)); idx += 1
            params[f"w_ih_l{l}{suffix}"] = w_ih.T          # (E_in, 4H)
            params[f"w_hh_l{l}{suffix}"] = w_hh.T          # (H, 4H)
            params[f"b_l{l}{suffix}"] = (b_ih + b_hh).reshape(1, -1)

    params["fc_w"] = jax.random.uniform(
        keys[idx], (hidden_size, output_size), jnp.float32, -k, k)
    params["fc_b"] = jax.random.uniform(
        keys[idx + 1], (1, output_size), jnp.float32, -k, k)
    return params


# ----------------------------------------------------------------------------
# Full forward pass equivalent to MyModel.forward(text, hidden).
# (The `hidden` argument is ignored, exactly as in the PyTorch module, since
#  self.lstm(embedding) uses default zero initial states.)
# ----------------------------------------------------------------------------
@functools.partial(jax.jit, static_argnames=("num_layers", "t_chunk"))
def my_model_forward(params, text, num_layers, t_chunk=16):
    # Embedding lookup — data-dependent gather kept in plain JAX glue.
    # TODO(synk): could be a pl.Element-BlockSpec gather kernel if needed.
    emb = jnp.take(params["embedding"], text, axis=0)         # (B, T, E)
    x = jnp.transpose(emb, (1, 0, 2)).astype(jnp.float32)     # (T, B, E)

    h_list, c_list = [], []
    layer_in = x
    for l in range(num_layers):
        y, h_l, c_l = bilstm_layer(
            layer_in,
            params[f"w_ih_l{l}"], params[f"w_hh_l{l}"], params[f"b_l{l}"],
            params[f"w_ih_l{l}_reverse"], params[f"w_hh_l{l}_reverse"],
            params[f"b_l{l}_reverse"], t_chunk=t_chunk)
        layer_in = y                                          # (T, B, 2H)
        h_list.append(h_l)                                    # (2, B, H)
        c_list.append(c_l)

    h_n = jnp.concatenate(h_list, axis=0)                     # (2L, B, H)
    c_n = jnp.concatenate(c_list, axis=0)                     # (2L, B, H)

    # out = fc(squeeze(h_n)) — torch.squeeze semantics preserved.  Tiny
    # (·, H) @ (H, O) with O=2: plain XLA beats a Pallas launch here.
    h_sq = jnp.squeeze(h_n)
    out = jnp.dot(h_sq, params["fc_w"],
                  preferred_element_type=jnp.float32) + params["fc_b"]
    return out, (h_n, c_n)


if __name__ == "__main__":
    # NOTE: B=2 fills only 2/8 sublanes and ~2 MXU rows — kept tiny to match
    # the module's example sizing; real deployments should batch B >= 8
    # (ideally 64-256) for MXU/vreg utilization (see perf review).
    vocab_size, embed_size, hidden_size = 50, 16, 32
    num_layers, output_size = 2, 2
    batch, seq = 2, 8

    key = jax.random.PRNGKey(0)
    pkey, tkey = jax.random.split(key)
    params = init_params(pkey, vocab_size, embed_size, hidden_size,
                         num_layers, output_size)
    text = jax.random.randint(tkey, (batch, seq), 0, vocab_size, jnp.int32)

    # init_hidden-equivalent (ignored by forward, same as the PyTorch module)
    hidden0 = (jnp.zeros((batch, num_layers, hidden_size), jnp.float32),
               jnp.zeros((batch, num_layers, hidden_size), jnp.float32))
    del hidden0  # unused, as in the reference forward

    # t_chunk=4 exercises the time-chunked grid + persistent scratch carries.
    out, (h_n, c_n) = my_model_forward(params, text, num_layers=num_layers,
                                       t_chunk=4)
    jax.block_until_ready((out, h_n, c_n))

    assert out.shape == (2 * num_layers, batch, output_size)
    assert h_n.shape == (2 * num_layers, batch, hidden_size)
    assert c_n.shape == (2 * num_layers, batch, hidden_size)
    print("KERNEL_OK")
</pallas_src>

<mosaic_0001>
module attributes {stable_mosaic.version = 11 : i64} {
  func.func @_bilstm_chunk_kernel(%arg0: i32, %arg1: memref<4x2x128xbf16, #tpu.memory_space<vmem>>, %arg2: memref<4x2x128xbf16, #tpu.memory_space<vmem>>, %arg3: memref<64x256xbf16, #tpu.memory_space<vmem>>, %arg4: memref<4x2x32xf32, #tpu.memory_space<vmem>>, %arg5: memref<4x2x32xf32, #tpu.memory_space<vmem>>, %arg6: memref<2x2x32xf32, #tpu.memory_space<vmem>>, %arg7: memref<2x2x32xf32, #tpu.memory_space<vmem>>, %arg8: memref<2x64xf32, #tpu.memory_space<vmem>>, %arg9: memref<2x64xf32, #tpu.memory_space<vmem>>) attributes {dimension_semantics = [#tpu.dimension_semantics<arbitrary>], iteration_bounds = array<i64: 2>, scalar_prefetch = 0 : i64, scratch_operands = 2 : i64, tpu.core_type = #tpu.core_type<tc>, window_params = [{transform_indices = @transform_0, window_bounds = array<i64: 4, 2, 128>}, {transform_indices = @transform_1, window_bounds = array<i64: 4, 2, 128>}, {pipeline_mode = #tpu.pipeline_mode<synchronous>, transform_indices = @transform_2, window_bounds = array<i64: 64, 256>}, {transform_indices = @transform_3, window_bounds = array<i64: 4, 2, 32>}, {transform_indices = @transform_4, window_bounds = array<i64: 4, 2, 32>}, {pipeline_mode = #tpu.pipeline_mode<synchronous>, transform_indices = @transform_5, window_bounds = array<i64: 2, 2, 32>}, {pipeline_mode = #tpu.pipeline_mode<synchronous>, transform_indices = @transform_6, window_bounds = array<i64: 2, 2, 32>}]} {
    %c0_i32 = arith.constant 0 : i32
    %0 = arith.cmpi eq, %arg0, %c0_i32 : i32
    %1 = arith.extui %0 : i1 to i32
    %c0_i32_0 = arith.constant 0 : i32
    %2 = arith.cmpi ne, %1, %c0_i32_0 : i32
    scf.if %2 {
      %cst_56 = arith.constant 0.000000e+00 : f32
      %235 = vector.broadcast %cst_56 : f32 to vector<2x64xf32>
      %c0_57 = arith.constant 0 : index
      %c0_58 = arith.constant 0 : index
      %236 = vector.load %arg8[%c0_57, %c0_58] : memref<2x64xf32, #tpu.memory_space<vmem>>, vector<2x64xf32>
      tpu.vector_store %arg8[%c0_57, %c0_58], %235 {strides = array<i32>} : memref<2x64xf32, #tpu.memory_space<vmem>>, vector<2x64xf32>,
      %cst_59 = arith.constant 0.000000e+00 : f32
      %237 = vector.broadcast %cst_59 : f32 to vector<2x64xf32>
      %c0_60 = arith.constant 0 : index
      %c0_61 = arith.constant 0 : index
      %238 = vector.load %arg9[%c0_60, %c0_61] : memref<2x64xf32, #tpu.memory_space<vmem>>, vector<2x64xf32>
      tpu.vector_store %arg9[%c0_60, %c0_61], %237 {strides = array<i32>} : memref<2x64xf32, #tpu.memory_space<vmem>>, vector<2x64xf32>,
    } else {
    }
    %c0 = arith.constant 0 : index
    %c0_1 = arith.constant 0 : index
    %3 = vector.load %arg3[%c0, %c0_1] : memref<64x256xbf16, #tpu.memory_space<vmem>>, vector<64x256xbf16>
    %4 = tpu.iota {dimensions = array<i32: 1>} : vector<2x128xi32>
    %c64_i32 = arith.constant 64 : i32
    %5 = vector.broadcast %c64_i32 : i32 to vector<2x128xi32>
    %6 = arith.cmpi sge, %4, %5 : vector<2x128xi32>
    %c96_i32 = arith.constant 96 : i32
    %7 = vector.broadcast %c96_i32 : i32 to vector<2x128xi32>
    %8 = arith.cmpi slt, %4, %7 : vector<2x128xi32>
    %9 = arith.andi %6, %8 : vector<2x128xi1>
    %cst = arith.constant 1.000000e+00 : f32
    %cst_2 = arith.constant 5.000000e-01 : f32
    %10 = vector.broadcast %cst : f32 to vector<2x128xf32>
    %11 = vector.broadcast %cst_2 : f32 to vector<2x128xf32>
    %12 = arith.select %9, %10, %11 : vector<2x128xi1>, vector<2x128xf32>
    %cst_3 = arith.constant 0.000000e+00 : f32
    %cst_4 = arith.constant 5.000000e-01 : f32
    %13 = vector.broadcast %cst_3 : f32 to vector<2x128xf32>
    %14 = vector.broadcast %cst_4 : f32 to vector<2x128xf32>
    %15 = arith.select %9, %13, %14 : vector<2x128xi1>, vector<2x128xf32>
    %c0_5 = arith.constant 0 : index
    %c0_6 = arith.constant 0 : index
    %16 = vector.load %arg8[%c0_5, %c0_6] : memref<2x64xf32, #tpu.memory_space<vmem>>, vector<2x64xf32>
    %c0_7 = arith.constant 0 : index
    %c0_8 = arith.constant 0 : index
    %17 = vector.load %arg9[%c0_7, %c0_8] : memref<2x64xf32, #tpu.memory_space<vmem>>, vector<2x64xf32>
    %c0_i32_9 = arith.constant 0 : i32
    %18 = arith.truncf %16 : vector<2x64xf32> to vector<2x64xbf16>
    %cst_10 = arith.constant dense<0.000000e+00> : vector<2x256xf32>
    %19 = tpu.matmul %18, %3, %cst_10 {dimension_numbers = #tpu.dot_dimension_numbers<[1], [0], [0], [1], [0, 0, 1, 1], [], []>} : vector<2x64xbf16>, vector<64x256xbf16>, vector<2x256xf32> -> vector<2x256xf32>
    %c3_i32 = arith.constant 3 : i32
    %20 = arith.subi %c3_i32, %c0_i32_9 : i32
    %21 = arith.index_cast %c0_i32_9 : i32 to index
    %c0_11 = arith.constant 0 : index
    %c0_12 = arith.constant 0 : index
    %22 = vector.load %arg1[%21, %c0_11, %c0_12] : memref<4x2x128xbf16, #tpu.memory_space<vmem>>, vector<1x2x128xbf16>
    %23 = vector.shape_cast %22 : vector<1x2x128xbf16> to vector<2x128xbf16>
    %24 = arith.extf %23 : vector<2x128xbf16> to vector<2x128xf32>
    %25 = vector.extract_strided_slice %19 {offsets = [0, 0], sizes = [2, 128], strides = [1, 1]} : vector<2x256xf32> to vector<2x128xf32>
    %26 = arith.addf %24, %25 : vector<2x128xf32>
    %27 = arith.mulf %26, %12 : vector<2x128xf32>
    %28 = math.tanh %27 : vector<2x128xf32>
    %29 = arith.mulf %28, %12 : vector<2x128xf32>
    %30 = arith.addf %29, %15 : vector<2x128xf32>
    %31 = arith.index_cast %20 : i32 to index
    %c0_13 = arith.constant 0 : index
    %c0_14 = arith.constant 0 : index
    %32 = vector.load %arg2[%31, %c0_13, %c0_14] : memref<4x2x128xbf16, #tpu.memory_space<vmem>>, vector<1x2x128xbf16>
    %33 = vector.shape_cast %32 : vector<1x2x128xbf16> to vector<2x128xbf16>
    %34 = arith.extf %33 : vector<2x128xbf16> to vector<2x128xf32>
    %35 = vector.extract_strided_slice %19 {offsets = [0, 128], sizes = [2, 128], strides = [1, 1]} : vector<2x256xf32> to vector<2x128xf32>
    %36 = arith.addf %34, %35 : vector<2x128xf32>
    %37 = arith.mulf %36, %12 : vector<2x128xf32>
    %38 = math.tanh %37 : vector<2x128xf32>
    %39 = arith.mulf %38, %12 : vector<2x128xf32>
    %40 = arith.addf %39, %15 : vector<2x128xf32>
    %41 = vector.extract_strided_slice %17 {offsets = [0, 0], sizes = [2, 32], strides = [1, 1]} : vector<2x64xf32> to vector<2x32xf32>
    %42 = vector.extract_strided_slice %30 {offsets = [0, 0], sizes = [2, 32], strides = [1, 1]} : vector<2x128xf32> to vector<2x32xf32>
    %43 = vector.extract_strided_slice %30 {offsets = [0, 32], sizes = [2, 32], strides = [1, 1]} : vector<2x128xf32> to vector<2x32xf32>
    %44 = vector.extract_strided_slice %30 {offsets = [0, 64], sizes = [2, 32], strides = [1, 1]} : vector<2x128xf32> to vector<2x32xf32>
    %45 = vector.extract_strided_slice %30 {offsets = [0, 96], sizes = [2, 32], strides = [1, 1]} : vector<2x128xf32> to vector<2x32xf32>
    %46 = arith.mulf %43, %41 : vector<2x32xf32>
    %47 = arith.mulf %42, %44 : vector<2x32xf32>
    %48 = arith.addf %46, %47 : vector<2x32xf32>
    %49 = math.tanh %48 : vector<2x32xf32>
    %50 = arith.mulf %45, %49 : vector<2x32xf32>
    %51 = vector.extract_strided_slice %17 {offsets = [0, 32], sizes = [2, 32], strides = [1, 1]} : vector<2x64xf32> to vector<2x32xf32>
    %52 = vector.extract_strided_slice %40 {offsets = [0, 0], sizes = [2, 32], strides = [1, 1]} : vector<2x128xf32> to vector<2x32xf32>
    %53 = vector.extract_strided_slice %40 {offsets = [0, 32], sizes = [2, 32], strides = [1, 1]} : vector<2x128xf32> to vector<2x32xf32>
    %54 = vector.extract_strided_slice %40 {offsets = [0, 64], sizes = [2, 32], strides = [1, 1]} : vector<2x128xf32> to vector<2x32xf32>
    %55 = vector.extract_strided_slice %40 {offsets = [0, 96], sizes = [2, 32], strides = [1, 1]} : vector<2x128xf32> to vector<2x32xf32>
    %56 = arith.mulf %53, %51 : vector<2x32xf32>
    %57 = arith.mulf %52, %54 : vector<2x32xf32>
    %58 = arith.addf %56, %57 : vector<2x32xf32>
    %59 = math.tanh %58 : vector<2x32xf32>
    %60 = arith.mulf %55, %59 : vector<2x32xf32>
    %61 = arith.index_cast %c0_i32_9 : i32 to index
    %c0_15 = arith.constant 0 : index
    %c0_16 = arith.constant 0 : index
    %62 = vector.load %arg4[%61, %c0_15, %c0_16] : memref<4x2x32xf32, #tpu.memory_space<vmem>>, vector<1x2x32xf32>
    %63 = vector.shape_cast %62 : vector<1x2x32xf32> to vector<2x32xf32>
    %64 = vector.shape_cast %50 : vector<2x32xf32> to vector<1x2x32xf32>
    tpu.vector_store %arg4[%61, %c0_15, %c0_16], %64 {strides = array<i32>} : memref<4x2x32xf32, #tpu.memory_space<vmem>>, vector<1x2x32xf32>,
    %65 = arith.index_cast %20 : i32 to index
    %c0_17 = arith.constant 0 : index
    %c0_18 = arith.constant 0 : index
    %66 = vector.load %arg5[%65, %c0_17, %c0_18] : memref<4x2x32xf32, #tpu.memory_space<vmem>>, vector<1x2x32xf32>
    %67 = vector.shape_cast %66 : vector<1x2x32xf32> to vector<2x32xf32>
    %68 = vector.shape_cast %60 : vector<2x32xf32> to vector<1x2x32xf32>
    tpu.vector_store %arg5[%65, %c0_17, %c0_18], %68 {strides = array<i32>} : memref<4x2x32xf32, #tpu.memory_space<vmem>>, vector<1x2x32xf32>,
    %69 = tpu.concatenate %50, %60 in 1 : vector<2x32xf32>, vector<2x32xf32> -> vector<2x64xf32>
    %70 = tpu.concatenate %48, %58 in 1 : vector<2x32xf32>, vector<2x32xf32> -> vector<2x64xf32>
    %c1_i32 = arith.constant 1 : i32
    %71 = arith.truncf %69 : vector<2x64xf32> to vector<2x64xbf16>
    %cst_19 = arith.constant dense<0.000000e+00> : vector<2x256xf32>
    %72 = tpu.matmul %71, %3, %cst_19 {dimension_numbers = #tpu.dot_dimension_numbers<[1], [0], [0], [1], [0, 0, 1, 1], [], []>} : vector<2x64xbf16>, vector<64x256xbf16>, vector<2x256xf32> -> vector<2x256xf32>
    %c3_i32_20 = arith.constant 3 : i32
    %73 = arith.subi %c3_i32_20, %c1_i32 : i32
    %74 = arith.index_cast %c1_i32 : i32 to index
    %c0_21 = arith.constant 0 : index
    %c0_22 = arith.constant 0 : index
    %75 = vector.load %arg1[%74, %c0_21, %c0_22] : memref<4x2x128xbf16, #tpu.memory_space<vmem>>, vector<1x2x128xbf16>
    %76 = vector.shape_cast %75 : vector<1x2x128xbf16> to vector<2x128xbf16>
    %77 = arith.extf %76 : vector<2x128xbf16> to vector<2x128xf32>
    %78 = vector.extract_strided_slice %72 {offsets = [0, 0], sizes = [2, 128], strides = [1, 1]} : vector<2x256xf32> to vector<2x128xf32>
    %79 = arith.addf %77, %78 : vector<2x128xf32>
    %80 = arith.mulf %79, %12 : vector<2x128xf32>
    %81 = math.tanh %80 : vector<2x128xf32>
    %82 = arith.mulf %81, %12 : vector<2x128xf32>
    %83 = arith.addf %82, %15 : vector<2x128xf32>
    %84 = arith.index_cast %73 : i32 to index
    %c0_23 = arith.constant 0 : index
    %c0_24 = arith.constant 0 : index
    %85 = vector.load %arg2[%84, %c0_23, %c0_24] : memref<4x2x128xbf16, #tpu.memory_space<vmem>>, vector<1x2x128xbf16>
    %86 = vector.shape_cast %85 : vector<1x2x128xbf16> to vector<2x128xbf16>
    %87 = arith.extf %86 : vector<2x128xbf16> to vector<2x128xf32>
    %88 = vector.extract_strided_slice %72 {offsets = [0, 128], sizes = [2, 128], strides = [1, 1]} : vector<2x256xf32> to vector<2x128xf32>
    %89 = arith.addf %87, %88 : vector<2x128xf32>
    %90 = arith.mulf %89, %12 : vector<2x128xf32>
    %91 = math.tanh %90 : vector<2x128xf32>
    %92 = arith.mulf %91, %12 : vector<2x128xf32>
    %93 = arith.addf %92, %15 : vector<2x128xf32>
    %94 = vector.extract_strided_slice %70 {offsets = [0, 0], sizes = [2, 32], strides = [1, 1]} : vector<2x64xf32> to vector<2x32xf32>
    %95 = vector.extract_strided_slice %83 {offsets = [0, 0], sizes = [2, 32], strides = [1, 1]} : vector<2x128xf32> to vector<2x32xf32>
    %96 = vector.extract_strided_slice %83 {offsets = [0, 32], sizes = [2, 32], strides = [1, 1]} : vector<2x128xf32> to vector<2x32xf32>
    %97 = vector.extract_strided_slice %83 {offsets = [0, 64], sizes = [2, 32], strides = [1, 1]} : vector<2x128xf32> to vector<2x32xf32>
    %98 = vector.extract_strided_slice %83 {offsets = [0, 96], sizes = [2, 32], strides = [1, 1]} : vector<2x128xf32> to vector<2x32xf32>
    %99 = arith.mulf %96, %94 : vector<2x32xf32>
    %100 = arith.mulf %95, %97 : vector<2x32xf32>
    %101 = arith.addf %99, %100 : vector<2x32xf32>
    %102 = math.tanh %101 : vector<2x32xf32>
    %103 = arith.mulf %98, %102 : vector<2x32xf32>
    %104 = vector.extract_strided_slice %70 {offsets = [0, 32], sizes = [2, 32], strides = [1, 1]} : vector<2x64xf32> to vector<2x32xf32>
    %105 = vector.extract_strided_slice %93 {offsets = [0, 0], sizes = [2, 32], strides = [1, 1]} : vector<2x128xf32> to vector<2x32xf32>
    %106 = vector.extract_strided_slice %93 {offsets = [0, 32], sizes = [2, 32], strides = [1, 1]} : vector<2x128xf32> to vector<2x32xf32>
    %107 = vector.extract_strided_slice %93 {offsets = [0, 64], sizes = [2, 32], strides = [1, 1]} : vector<2x128xf32> to vector<2x32xf32>
    %108 = vector.extract_strided_slice %93 {offsets = [0, 96], sizes = [2, 32], strides = [1, 1]} : vector<2x128xf32> to vector<2x32xf32>
    %109 = arith.mulf %106, %104 : vector<2x32xf32>
    %110 = arith.mulf %105, %107 : vector<2x32xf32>
    %111 = arith.addf %109, %110 : vector<2x32xf32>
    %112 = math.tanh %111 : vector<2x32xf32>
    %113 = arith.mulf %108, %112 : vector<2x32xf32>
    %114 = arith.index_cast %c1_i32 : i32 to index
    %c0_25 = arith.constant 0 : index
    %c0_26 = arith.constant 0 : index
    %115 = vector.load %arg4[%114, %c0_25, %c0_26] : memref<4x2x32xf32, #tpu.memory_space<vmem>>, vector<1x2x32xf32>
    %116 = vector.shape_cast %115 : vector<1x2x32xf32> to vector<2x32xf32>
    %117 = vector.shape_cast %103 : vector<2x32xf32> to vector<1x2x32xf32>
    tpu.vector_store %arg4[%114, %c0_25, %c0_26], %117 {strides = array<i32>} : memref<4x2x32xf32, #tpu.memory_space<vmem>>, vector<1x2x32xf32>,
    %118 = arith.index_cast %73 : i32 to index
    %c0_27 = arith.constant 0 : index
    %c0_28 = arith.constant 0 : index
    %119 = vector.load %arg5[%118, %c0_27, %c0_28] : memref<4x2x32xf32, #tpu.memory_space<vmem>>, vector<1x2x32xf32>
    %120 = vector.shape_cast %119 : vector<1x2x32xf32> to vector<2x32xf32>
    %121 = vector.shape_cast %113 : vector<2x32xf32> to vector<1x2x32xf32>
    tpu.vector_store %arg5[%118, %c0_27, %c0_28], %121 {strides = array<i32>} : memref<4x2x32xf32, #tpu.memory_space<vmem>>, vector<1x2x32xf32>,
    %122 = tpu.concatenate %103, %113 in 1 : vector<2x32xf32>, vector<2x32xf32> -> vector<2x64xf32>
    %123 = tpu.concatenate %101, %111 in 1 : vector<2x32xf32>, vector<2x32xf32> -> vector<2x64xf32>
    %c2_i32 = arith.constant 2 : i32
    %124 = arith.truncf %122 : vector<2x64xf32> to vector<2x64xbf16>
    %cst_29 = arith.constant dense<0.000000e+00> : vector<2x256xf32>
    %125 = tpu.matmul %124, %3, %cst_29 {dimension_numbers = #tpu.dot_dimension_numbers<[1], [0], [0], [1], [0, 0, 1, 1], [], []>} : vector<2x64xbf16>, vector<64x256xbf16>, vector<2x256xf32> -> vector<2x256xf32>
    %c3_i32_30 = arith.constant 3 : i32
    %126 = arith.subi %c3_i32_30, %c2_i32 : i32
    %127 = arith.index_cast %c2_i32 : i32 to index
    %c0_31 = arith.constant 0 : index
    %c0_32 = arith.constant 0 : index
    %128 = vector.load %arg1[%127, %c0_31, %c0_32] : memref<4x2x128xbf16, #tpu.memory_space<vmem>>, vector<1x2x128xbf16>
    %129 = vector.shape_cast %128 : vector<1x2x128xbf16> to vector<2x128xbf16>
    %130 = arith.extf %129 : vector<2x128xbf16> to vector<2x128xf32>
    %131 = vector.extract_strided_slice %125 {offsets = [0, 0], sizes = [2, 128], strides = [1, 1]} : vector<2x256xf32> to vector<2x128xf32>
    %132 = arith.addf %130, %131 : vector<2x128xf32>
    %133 = arith.mulf %132, %12 : vector<2x128xf32>
    %134 = math.tanh %133 : vector<2x128xf32>
    %135 = arith.mulf %134, %12 : vector<2x128xf32>
    %136 = arith.addf %135, %15 : vector<2x128xf32>
    %137 = arith.index_cast %126 : i32 to index
    %c0_33 = arith.constant 0 : index
    %c0_34 = arith.constant 0 : index
    %138 = vector.load %arg2[%137, %c0_33, %c0_34] : memref<4x2x128xbf16, #tpu.memory_space<vmem>>, vector<1x2x128xbf16>
    %139 = vector.shape_cast %138 : vector<1x2x128xbf16> to vector<2x128xbf16>
    %140 = arith.extf %139 : vector<2x128xbf16> to vector<2x128xf32>
    %141 = vector.extract_strided_slice %125 {offsets = [0, 128], sizes = [2, 128], strides = [1, 1]} : vector<2x256xf32> to vector<2x128xf32>
    %142 = arith.addf %140, %141 : vector<2x128xf32>
    %143 = arith.mulf %142, %12 : vector<2x128xf32>
    %144 = math.tanh %143 : vector<2x128xf32>
    %145 = arith.mulf %144, %12 : vector<2x128xf32>
    %146 = arith.addf %145, %15 : vector<2x128xf32>
    %147 = vector.extract_strided_slice %123 {offsets = [0, 0], sizes = [2, 32], strides = [1, 1]} : vector<2x64xf32> to vector<2x32xf32>
    %148 = vector.extract_strided_slice %136 {offsets = [0, 0], sizes = [2, 32], strides = [1, 1]} : vector<2x128xf32> to vector<2x32xf32>
    %149 = vector.extract_strided_slice %136 {offsets = [0, 32], sizes = [2, 32], strides = [1, 1]} : vector<2x128xf32> to vector<2x32xf32>
    %150 = vector.extract_strided_slice %136 {offsets = [0, 64], sizes = [2, 32], strides = [1, 1]} : vector<2x128xf32> to vector<2x32xf32>
    %151 = vector.extract_strided_slice %136 {offsets = [0, 96], sizes = [2, 32], strides = [1, 1]} : vector<2x128xf32> to vector<2x32xf32>
    %152 = arith.mulf %149, %147 : vector<2x32xf32>
    %153 = arith.mulf %148, %150 : vector<2x32xf32>
    %154 = arith.addf %152, %153 : vector<2x32xf32>
    %155 = math.tanh %154 : vector<2x32xf32>
    %156 = arith.mulf %151, %155 : vector<2x32xf32>
    %157 = vector.extract_strided_slice %123 {offsets = [0, 32], sizes = [2, 32], strides = [1, 1]} : vector<2x64xf32> to vector<2x32xf32>
    %158 = vector.extract_strided_slice %146 {offsets = [0, 0], sizes = [2, 32], strides = [1, 1]} : vector<2x128xf32> to vector<2x32xf32>
    %159 = vector.extract_strided_slice %146 {offsets = [0, 32], sizes = [2, 32], strides = [1, 1]} : vector<2x128xf32> to vector<2x32xf32>
    %160 = vector.extract_strided_slice %146 {offsets = [0, 64], sizes = [2, 32], strides = [1, 1]} : vector<2x128xf32> to vector<2x32xf32>
    %161 = vector.extract_strided_slice %146 {offsets = [0, 96], sizes = [2, 32], strides = [1, 1]} : vector<2x128xf32> to vector<2x32xf32>
    %162 = arith.mulf %159, %157 : vector<2x32xf32>
    %163 = arith.mulf %158, %160 : vector<2x32xf32>
    %164 = arith.addf %162, %163 : vector<2x32xf32>
    %165 = math.tanh %164 : vector<2x32xf32>
    %166 = arith.mulf %161, %165 : vector<2x32xf32>
    %167 = arith.index_cast %c2_i32 : i32 to index
    %c0_35 = arith.constant 0 : index
    %c0_36 = arith.constant 0 : index
    %168 = vector.load %arg4[%167, %c0_35, %c0_36] : memref<4x2x32xf32, #tpu.memory_space<vmem>>, vector<1x2x32xf32>
    %169 = vector.shape_cast %168 : vector<1x2x32xf32> to vector<2x32xf32>
    %170 = vector.shape_cast %156 : vector<2x32xf32> to vector<1x2x32xf32>
    tpu.vector_store %arg4[%167, %c0_35, %c0_36], %170 {strides = array<i32>} : memref<4x2x32xf32, #tpu.memory_space<vmem>>, vector<1x2x32xf32>,
    %171 = arith.index_cast %126 : i32 to index
    %c0_37 = arith.constant 0 : index
    %c0_38 = arith.constant 0 : index
    %172 = vector.load %arg5[%171, %c0_37, %c0_38] : memref<4x2x32xf32, #tpu.memory_space<vmem>>, vector<1x2x32xf32>
    %173 = vector.shape_cast %172 : vector<1x2x32xf32> to vector<2x32xf32>
    %174 = vector.shape_cast %166 : vector<2x32xf32> to vector<1x2x32xf32>
    tpu.vector_store %arg5[%171, %c0_37, %c0_38], %174 {strides = array<i32>} : memref<4x2x32xf32, #tpu.memory_space<vmem>>, vector<1x2x32xf32>,
    %175 = tpu.concatenate %156, %166 in 1 : vector<2x32xf32>, vector<2x32xf32> -> vector<2x64xf32>
    %176 = tpu.concatenate %154, %164 in 1 : vector<2x32xf32>, vector<2x32xf32> -> vector<2x64xf32>
    %c3_i32_39 = arith.constant 3 : i32
    %177 = arith.truncf %175 : vector<2x64xf32> to vector<2x64xbf16>
    %cst_40 = arith.constant dense<0.000000e+00> : vector<2x256xf32>
    %178 = tpu.matmul %177, %3, %cst_40 {dimension_numbers = #tpu.dot_dimension_numbers<[1], [0], [0], [1], [0, 0, 1, 1], [], []>} : vector<2x64xbf16>, vector<64x256xbf16>, vector<2x256xf32> -> vector<2x256xf32>
    %c3_i32_41 = arith.constant 3 : i32
    %179 = arith.subi %c3_i32_41, %c3_i32_39 : i32
    %180 = arith.index_cast %c3_i32_39 : i32 to index
    %c0_42 = arith.constant 0 : index
    %c0_43 = arith.constant 0 : index
    %181 = vector.load %arg1[%180, %c0_42, %c0_43] : memref<4x2x128xbf16, #tpu.memory_space<vmem>>, vector<1x2x128xbf16>
    %182 = vector.shape_cast %181 : vector<1x2x128xbf16> to vector<2x128xbf16>
    %183 = arith.extf %182 : vector<2x128xbf16> to vector<2x128xf32>
    %184 = vector.extract_strided_slice %178 {offsets = [0, 0], sizes = [2, 128], strides = [1, 1]} : vector<2x256xf32> to vector<2x128xf32>
    %185 = arith.addf %183, %184 : vector<2x128xf32>
    %186 = arith.mulf %185, %12 : vector<2x128xf32>
    %187 = math.tanh %186 : vector<2x128xf32>
    %188 = arith.mulf %187, %12 : vector<2x128xf32>
    %189 = arith.addf %188, %15 : vector<2x128xf32>
    %190 = arith.index_cast %179 : i32 to index
    %c0_44 = arith.constant 0 : index
    %c0_45 = arith.constant 0 : index
    %191 = vector.load %arg2[%190, %c0_44, %c0_45] : memref<4x2x128xbf16, #tpu.memory_space<vmem>>, vector<1x2x128xbf16>
    %192 = vector.shape_cast %191 : vector<1x2x128xbf16> to vector<2x128xbf16>
    %193 = arith.extf %192 : vector<2x128xbf16> to vector<2x128xf32>
    %194 = vector.extract_strided_slice %178 {offsets = [0, 128], sizes = [2, 128], strides = [1, 1]} : vector<2x256xf32> to vector<2x128xf32>
    %195 = arith.addf %193, %194 : vector<2x128xf32>
    %196 = arith.mulf %195, %12 : vector<2x128xf32>
    %197 = math.tanh %196 : vector<2x128xf32>
    %198 = arith.mulf %197, %12 : vector<2x128xf32>
    %199 = arith.addf %198, %15 : vector<2x128xf32>
    %200 = vector.extract_strided_slice %176 {offsets = [0, 0], sizes = [2, 32], strides = [1, 1]} : vector<2x64xf32> to vector<2x32xf32>
    %201 = vector.extract_strided_slice %189 {offsets = [0, 0], sizes = [2, 32], strides = [1, 1]} : vector<2x128xf32> to vector<2x32xf32>
    %202 = vector.extract_strided_slice %189 {offsets = [0, 32], sizes = [2, 32], strides = [1, 1]} : vector<2x128xf32> to vector<2x32xf32>
    %203 = vector.extract_strided_slice %189 {offsets = [0, 64], sizes = [2, 32], strides = [1, 1]} : vector<2x128xf32> to vector<2x32xf32>
    %204 = vector.extract_strided_slice %189 {offsets = [0, 96], sizes = [2, 32], strides = [1, 1]} : vector<2x128xf32> to vector<2x32xf32>
    %205 = arith.mulf %202, %200 : vector<2x32xf32>
    %206 = arith.mulf %201, %203 : vector<2x32xf32>
    %207 = arith.addf %205, %206 : vector<2x32xf32>
    %208 = math.tanh %207 : vector<2x32xf32>
    %209 = arith.mulf %204, %208 : vector<2x32xf32>
    %210 = vector.extract_strided_slice %176 {offsets = [0, 32], sizes = [2, 32], strides = [1, 1]} : vector<2x64xf32> to vector<2x32xf32>
    %211 = vector.extract_strided_slice %199 {offsets = [0, 0], sizes = [2, 32], strides = [1, 1]} : vector<2x128xf32> to vector<2x32xf32>
    %212 = vector.extract_strided_slice %199 {offsets = [0, 32], sizes = [2, 32], strides = [1, 1]} : vector<2x128xf32> to vector<2x32xf32>
    %213 = vector.extract_strided_slice %199 {offsets = [0, 64], sizes = [2, 32], strides = [1, 1]} : vector<2x128xf32> to vector<2x32xf32>
    %214 = vector.extract_strided_slice %199 {offsets = [0, 96], sizes = [2, 32], strides = [1, 1]} : vector<2x128xf32> to vector<2x32xf32>
    %215 = arith.mulf %212, %210 : vector<2x32xf32>
    %216 = arith.mulf %211, %213 : vector<2x32xf32>
    %217 = arith.addf %215, %216 : vector<2x32xf32>
    %218 = math.tanh %217 : vector<2x32xf32>
    %219 = arith.mulf %214, %218 : vector<2x32xf32>
    %220 = arith.index_cast %c3_i32_39 : i32 to index
    %c0_46 = arith.constant 0 : index
    %c0_47 = arith.constant 0 : index
    %221 = vector.load %arg4[%220, %c0_46, %c0_47] : memref<4x2x32xf32, #tpu.memory_space<vmem>>, vector<1x2x32xf32>
    %222 = vector.shape_cast %221 : vector<1x2x32xf32> to vector<2x32xf32>
    %223 = vector.shape_cast %209 : vector<2x32xf32> to vector<1x2x32xf32>
    tpu.vector_store %arg4[%220, %c0_46, %c0_47], %223 {strides = array<i32>} : memref<4x2x32xf32, #tpu.memory_space<vmem>>, vector<1x2x32xf32>,
    %224 = arith.index_cast %179 : i32 to index
    %c0_48 = arith.constant 0 : index
    %c0_49 = arith.constant 0 : index
    %225 = vector.load %arg5[%224, %c0_48, %c0_49] : memref<4x2x32xf32, #tpu.memory_space<vmem>>, vector<1x2x32xf32>
    %226 = vector.shape_cast %225 : vector<1x2x32xf32> to vector<2x32xf32>
    %227 = vector.shape_cast %219 : vector<2x32xf32> to vector<1x2x32xf32>
    tpu.vector_store %arg5[%224, %c0_48, %c0_49], %227 {strides = array<i32>} : memref<4x2x32xf32, #tpu.memory_space<vmem>>, vector<1x2x32xf32>,
    %228 = tpu.concatenate %209, %219 in 1 : vector<2x32xf32>, vector<2x32xf32> -> vector<2x64xf32>
    %229 = tpu.concatenate %207, %217 in 1 : vector<2x32xf32>, vector<2x32xf32> -> vector<2x64xf32>
    %c4_i32 = arith.constant 4 : i32
    %c0_50 = arith.constant 0 : index
    %c0_51 = arith.constant 0 : index
    %230 = vector.load %arg8[%c0_50, %c0_51] : memref<2x64xf32, #tpu.memory_space<vmem>>, vector<2x64xf32>
    tpu.vector_store %arg8[%c0_50, %c0_51], %228 {strides = array<i32>} : memref<2x64xf32, #tpu.memory_space<vmem>>, vector<2x64xf32>,
    %c0_52 = arith.constant 0 : index
    %c0_53 = arith.constant 0 : index
    %231 = vector.load %arg9[%c0_52, %c0_53] : memref<2x64xf32, #tpu.memory_space<vmem>>, vector<2x64xf32>
    tpu.vector_store %arg9[%c0_52, %c0_53], %229 {strides = array<i32>} : memref<2x64xf32, #tpu.memory_space<vmem>>, vector<2x64xf32>,
    %c1_i32_54 = arith.constant 1 : i32
    %232 = arith.cmpi eq, %arg0, %c1_i32_54 : i32
    %233 = arith.extui %232 : i1 to i32
    %c0_i32_55 = arith.constant 0 : i32
    %234 = arith.cmpi ne, %233, %c0_i32_55 : i32
    scf.if %234 {
      %235 = vector.extract_strided_slice %228 {offsets = [0, 0], sizes = [2, 32], strides = [1, 1]} : vector<2x64xf32> to vector<2x32xf32>
      %c0_56 = arith.constant 0 : index
      %c0_57 = arith.constant 0 : index
      %c0_58 = arith.constant 0 : index
      %236 = vector.load %arg6[%c0_56, %c0_57, %c0_58] : memref<2x2x32xf32, #tpu.memory_space<vmem>>, vector<1x2x32xf32>
      %237 = vector.shape_cast %236 : vector<1x2x32xf32> to vector<2x32xf32>
      %238 = vector.shape_cast %235 : vector<2x32xf32> to vector<1x2x32xf32>
      tpu.vector_store %arg6[%c0_56, %c0_57, %c0_58], %238 {strides = array<i32>} : memref<2x2x32xf32, #tpu.memory_space<vmem>>, vector<1x2x32xf32>,
      %239 = vector.extract_strided_slice %228 {offsets = [0, 32], sizes = [2, 32], strides = [1, 1]} : vector<2x64xf32> to vector<2x32xf32>
      %c1 = arith.constant 1 : index
      %c0_59 = arith.constant 0 : index
      %c0_60 = arith.constant 0 : index
      %240 = vector.load %arg6[%c1, %c0_59, %c0_60] : memref<2x2x32xf32, #tpu.memory_space<vmem>>, vector<1x2x32xf32>
      %241 = vector.shape_cast %240 : vector<1x2x32xf32> to vector<2x32xf32>
      %242 = vector.shape_cast %239 : vector<2x32xf32> to vector<1x2x32xf32>
      tpu.vector_store %arg6[%c1, %c0_59, %c0_60], %242 {strides = array<i32>} : memref<2x2x32xf32, #tpu.memory_space<vmem>>, vector<1x2x32xf32>,
      %243 = vector.extract_strided_slice %229 {offsets = [0, 0], sizes = [2, 32], strides = [1, 1]} : vector<2x64xf32> to vector<2x32xf32>
      %c0_61 = arith.constant 0 : index
      %c0_62 = arith.constant 0 : index
      %c0_63 = arith.constant 0 : index
      %244 = vector.load %arg7[%c0_61, %c0_62, %c0_63] : memref<2x2x32xf32, #tpu.memory_space<vmem>>, vector<1x2x32xf32>
      %245 = vector.shape_cast %244 : vector<1x2x32xf32> to vector<2x32xf32>
      %246 = vector.shape_cast %243 : vector<2x32xf32> to vector<1x2x32xf32>
      tpu.vector_store %arg7[%c0_61, %c0_62, %c0_63], %246 {strides = array<i32>} : memref<2x2x32xf32, #tpu.memory_space<vmem>>, vector<1x2x32xf32>,
      %247 = vector.extract_strided_slice %229 {offsets = [0, 32], sizes = [2, 32], strides = [1, 1]} : vector<2x64xf32> to vector<2x32xf32>
      %c1_64 = arith.constant 1 : index
      %c0_65 = arith.constant 0 : index
      %c0_66 = arith.constant 0 : index
      %248 = vector.load %arg7[%c1_64, %c0_65, %c0_66] : memref<2x2x32xf32, #tpu.memory_space<vmem>>, vector<1x2x32xf32>
      %249 = vector.shape_cast %248 : vector<1x2x32xf32> to vector<2x32xf32>
      %250 = vector.shape_cast %247 : vector<2x32xf32> to vector<1x2x32xf32>
      tpu.vector_store %arg7[%c1_64, %c0_65, %c0_66], %250 {strides = array<i32>} : memref<2x2x32xf32, #tpu.memory_space<vmem>>, vector<1x2x32xf32>,
    } else {
    }
    return
  }
  func.func @transform_0(%arg0: i32) -> (i32, i32, i32) {
    %c0_i32 = arith.constant 0 : i32
    %c0_i32_0 = arith.constant 0 : i32
    %c0_i32_1 = arith.constant 0 : i32
    return %arg0, %c0_i32, %c0_i32_0 : i32, i32, i32
  }
  func.func @transform_1(%arg0: i32) -> (i32, i32, i32) {
    %c1_i32 = arith.constant 1 : i32
    %0 = arith.subi %c1_i32, %arg0 : i32
    %c0_i32 = arith.constant 0 : i32
    %c0_i32_0 = arith.constant 0 : i32
    %c0_i32_1 = arith.constant 0 : i32
    return %0, %c0_i32, %c0_i32_0 : i32, i32, i32
  }
  func.func @transform_2(%arg0: i32) -> (i32, i32) {
    %c0_i32 = arith.constant 0 : i32
    %c0_i32_0 = arith.constant 0 : i32
    %c0_i32_1 = arith.constant 0 : i32
    return %c0_i32, %c0_i32_0 : i32, i32
  }
  func.func @transform_3(%arg0: i32) -> (i32, i32, i32) {
    %c0_i32 = arith.constant 0 : i32
    %c0_i32_0 = arith.constant 0 : i32
    %c0_i32_1 = arith.constant 0 : i32
    return %arg0, %c0_i32, %c0_i32_0 : i32, i32, i32
  }
  func.func @transform_4(%arg0: i32) -> (i32, i32, i32) {
    %c1_i32 = arith.constant 1 : i32
    %0 = arith.subi %c1_i32, %arg0 : i32
    %c0_i32 = arith.constant 0 : i32
    %c0_i32_0 = arith.constant 0 : i32
    %c0_i32_1 = arith.constant 0 : i32
    return %0, %c0_i32, %c0_i32_0 : i32, i32, i32
  }
  func.func @transform_5(%arg0: i32) -> (i32, i32, i32) {
    %c0_i32 = arith.constant 0 : i32
    %c0_i32_0 = arith.constant 0 : i32
    %c0_i32_1 = arith.constant 0 : i32
    %c0_i32_2 = arith.constant 0 : i32
    return %c0_i32, %c0_i32_0, %c0_i32_1 : i32, i32, i32
  }
  func.func @transform_6(%arg0: i32) -> (i32, i32, i32) {
    %c0_i32 = arith.constant 0 : i32
    %c0_i32_0 = arith.constant 0 : i32
    %c0_i32_1 = arith.constant 0 : i32
    %c0_i32_2 = arith.constant 0 : i32
    return %c0_i32, %c0_i32_0, %c0_i32_1 : i32, i32, i32
  }
}

module attributes {stable_mosaic.version = 11 : i64} {
  func.func @_bilstm_chunk_kernel(%arg0: i32, %arg1: memref<4x2x128xbf16, #tpu.memory_space<vmem>>, %arg2: memref<4x2x128xbf16, #tpu.memory_space<vmem>>, %arg3: memref<64x256xbf16, #tpu.memory_space<vmem>>, %arg4: memref<4x2x32xf32, #tpu.memory_space<vmem>>, %arg5: memref<4x2x32xf32, #tpu.memory_space<vmem>>, %arg6: memref<2x2x32xf32, #tpu.memory_space<vmem>>, %arg7: memref<2x2x32xf32, #tpu.memory_space<vmem>>, %arg8: memref<2x64xf32, #tpu.memory_space<vmem>>, %arg9: memref<2x64xf32, #tpu.memory_space<vmem>>) attributes {dimension_semantics = [#tpu.dimension_semantics<arbitrary>], iteration_bounds = array<i64: 2>, scalar_prefetch = 0 : i64, scratch_operands = 2 : i64, tpu.core_type = #tpu.core_type<tc>, window_params = [{transform_indices = @transform_0, window_bounds = array<i64: 4, 2, 128>}, {transform_indices = @transform_1, window_bounds = array<i64: 4, 2, 128>}, {pipeline_mode = #tpu.pipeline_mode<synchronous>, transform_indices = @transform_2, window_bounds = array<i64: 64, 256>}, {transform_indices = @transform_3, window_bounds = array<i64: 4, 2, 32>}, {transform_indices = @transform_4, window_bounds = array<i64: 4, 2, 32>}, {pipeline_mode = #tpu.pipeline_mode<synchronous>, transform_indices = @transform_5, window_bounds = array<i64: 2, 2, 32>}, {pipeline_mode = #tpu.pipeline_mode<synchronous>, transform_indices = @transform_6, window_bounds = array<i64: 2, 2, 32>}]} {
    %c0_i32 = arith.constant 0 : i32
    %0 = arith.cmpi eq, %arg0, %c0_i32 : i32
    %1 = arith.extui %0 : i1 to i32
    %c0_i32_0 = arith.constant 0 : i32
    %2 = arith.cmpi ne, %1, %c0_i32_0 : i32
    scf.if %2 {
      %cst_56 = arith.constant 0.000000e+00 : f32
      %235 = vector.broadcast %cst_56 : f32 to vector<2x64xf32>
      %c0_57 = arith.constant 0 : index
      %c0_58 = arith.constant 0 : index
      %236 = vector.load %arg8[%c0_57, %c0_58] : memref<2x64xf32, #tpu.memory_space<vmem>>, vector<2x64xf32>
      tpu.vector_store %arg8[%c0_57, %c0_58], %235 {strides = array<i32>} : memref<2x64xf32, #tpu.memory_space<vmem>>, vector<2x64xf32>,
      %cst_59 = arith.constant 0.000000e+00 : f32
      %237 = vector.broadcast %cst_59 : f32 to vector<2x64xf32>
      %c0_60 = arith.constant 0 : index
      %c0_61 = arith.constant 0 : index
      %238 = vector.load %arg9[%c0_60, %c0_61] : memref<2x64xf32, #tpu.memory_space<vmem>>, vector<2x64xf32>
      tpu.vector_store %arg9[%c0_60, %c0_61], %237 {strides = array<i32>} : memref<2x64xf32, #tpu.memory_space<vmem>>, vector<2x64xf32>,
    } else {
    }
    %c0 = arith.constant 0 : index
    %c0_1 = arith.constant 0 : index
    %3 = vector.load %arg3[%c0, %c0_1] : memref<64x256xbf16, #tpu.memory_space<vmem>>, vector<64x256xbf16>
    %4 = tpu.iota {dimensions = array<i32: 1>} : vector<2x128xi32>
    %c64_i32 = arith.constant 64 : i32
    %5 = vector.broadcast %c64_i32 : i32 to vector<2x128xi32>
    %6 = arith.cmpi sge, %4, %5 : vector<2x128xi32>
    %c96_i32 = arith.constant 96 : i32
    %7 = vector.broadcast %c96_i32 : i32 to vector<2x128xi32>
    %8 = arith.cmpi slt, %4, %7 : vector<2x128xi32>
    %9 = arith.andi %6, %8 : vector<2x128xi1>
    %cst = arith.constant 1.000000e+00 : f32
    %cst_2 = arith.constant 5.000000e-01 : f32
    %10 = vector.broadcast %cst : f32 to vector<2x128xf32>
    %11 = vector.broadcast %cst_2 : f32 to vector<2x128xf32>
    %12 = arith.select %9, %10, %11 : vector<2x128xi1>, vector<2x128xf32>
    %cst_3 = arith.constant 0.000000e+00 : f32
    %cst_4 = arith.constant 5.000000e-01 : f32
    %13 = vector.broadcast %cst_3 : f32 to vector<2x128xf32>
    %14 = vector.broadcast %cst_4 : f32 to vector<2x128xf32>
    %15 = arith.select %9, %13, %14 : vector<2x128xi1>, vector<2x128xf32>
    %c0_5 = arith.constant 0 : index
    %c0_6 = arith.constant 0 : index
    %16 = vector.load %arg8[%c0_5, %c0_6] : memref<2x64xf32, #tpu.memory_space<vmem>>, vector<2x64xf32>
    %c0_7 = arith.constant 0 : index
    %c0_8 = arith.constant 0 : index
    %17 = vector.load %arg9[%c0_7, %c0_8] : memref<2x64xf32, #tpu.memory_space<vmem>>, vector<2x64xf32>
    %c0_i32_9 = arith.constant 0 : i32
    %18 = arith.truncf %16 : vector<2x64xf32> to vector<2x64xbf16>
    %cst_10 = arith.constant dense<0.000000e+00> : vector<2x256xf32>
    %19 = tpu.matmul %18, %3, %cst_10 {dimension_numbers = #tpu.dot_dimension_numbers<[1], [0], [0], [1], [0, 0, 1, 1], [], []>} : vector<2x64xbf16>, vector<64x256xbf16>, vector<2x256xf32> -> vector<2x256xf32>
    %c3_i32 = arith.constant 3 : i32
    %20 = arith.subi %c3_i32, %c0_i32_9 : i32
    %21 = arith.index_cast %c0_i32_9 : i32 to index
    %c0_11 = arith.constant 0 : index
    %c0_12 = arith.constant 0 : index
    %22 = vector.load %arg1[%21, %c0_11, %c0_12] : memref<4x2x128xbf16, #tpu.memory_space<vmem>>, vector<1x2x128xbf16>
    %23 = vector.shape_cast %22 : vector<1x2x128xbf16> to vector<2x128xbf16>
    %24 = arith.extf %23 : vector<2x128xbf16> to vector<2x128xf32>
    %25 = vector.extract_strided_slice %19 {offsets = [0, 0], sizes = [2, 128], strides = [1, 1]} : vector<2x256xf32> to vector<2x128xf32>
    %26 = arith.addf %24, %25 : vector<2x128xf32>
    %27 = arith.mulf %26, %12 : vector<2x128xf32>
    %28 = math.tanh %27 : vector<2x128xf32>
    %29 = arith.mulf %28, %12 : vector<2x128xf32>
    %30 = arith.addf %29, %15 : vector<2x128xf32>
    %31 = arith.index_cast %20 : i32 to index
    %c0_13 = arith.constant 0 : index
    %c0_14 = arith.constant 0 : index
    %32 = vector.load %arg2[%31, %c0_13, %c0_14] : memref<4x2x128xbf16, #tpu.memory_space<vmem>>, vector<1x2x128xbf16>
    %33 = vector.shape_cast %32 : vector<1x2x128xbf16> to vector<2x128xbf16>
    %34 = arith.extf %33 : vector<2x128xbf16> to vector<2x128xf32>
    %35 = vector.extract_strided_slice %19 {offsets = [0, 128], sizes = [2, 128], strides = [1, 1]} : vector<2x256xf32> to vector<2x128xf32>
    %36 = arith.addf %34, %35 : vector<2x128xf32>
    %37 = arith.mulf %36, %12 : vector<2x128xf32>
    %38 = math.tanh %37 : vector<2x128xf32>
    %39 = arith.mulf %38, %12 : vector<2x128xf32>
    %40 = arith.addf %39, %15 : vector<2x128xf32>
    %41 = vector.extract_strided_slice %17 {offsets = [0, 0], sizes = [2, 32], strides = [1, 1]} : vector<2x64xf32> to vector<2x32xf32>
    %42 = vector.extract_strided_slice %30 {offsets = [0, 0], sizes = [2, 32], strides = [1, 1]} : vector<2x128xf32> to vector<2x32xf32>
    %43 = vector.extract_strided_slice %30 {offsets = [0, 32], sizes = [2, 32], strides = [1, 1]} : vector<2x128xf32> to vector<2x32xf32>
    %44 = vector.extract_strided_slice %30 {offsets = [0, 64], sizes = [2, 32], strides = [1, 1]} : vector<2x128xf32> to vector<2x32xf32>
    %45 = vector.extract_strided_slice %30 {offsets = [0, 96], sizes = [2, 32], strides = [1, 1]} : vector<2x128xf32> to vector<2x32xf32>
    %46 = arith.mulf %43, %41 : vector<2x32xf32>
    %47 = arith.mulf %42, %44 : vector<2x32xf32>
    %48 = arith.addf %46, %47 : vector<2x32xf32>
    %49 = math.tanh %48 : vector<2x32xf32>
    %50 = arith.mulf %45, %49 : vector<2x32xf32>
    %51 = vector.extract_strided_slice %17 {offsets = [0, 32], sizes = [2, 32], strides = [1, 1]} : vector<2x64xf32> to vector<2x32xf32>
    %52 = vector.extract_strided_slice %40 {offsets = [0, 0], sizes = [2, 32], strides = [1, 1]} : vector<2x128xf32> to vector<2x32xf32>
    %53 = vector.extract_strided_slice %40 {offsets = [0, 32], sizes = [2, 32], strides = [1, 1]} : vector<2x128xf32> to vector<2x32xf32>
    %54 = vector.extract_strided_slice %40 {offsets = [0, 64], sizes = [2, 32], strides = [1, 1]} : vector<2x128xf32> to vector<2x32xf32>
    %55 = vector.extract_strided_slice %40 {offsets = [0, 96], sizes = [2, 32], strides = [1, 1]} : vector<2x128xf32> to vector<2x32xf32>
    %56 = arith.mulf %53, %51 : vector<2x32xf32>
    %57 = arith.mulf %52, %54 : vector<2x32xf32>
    %58 = arith.addf %56, %57 : vector<2x32xf32>
    %59 = math.tanh %58 : vector<2x32xf32>
    %60 = arith.mulf %55, %59 : vector<2x32xf32>
    %61 = arith.index_cast %c0_i32_9 : i32 to index
    %c0_15 = arith.constant 0 : index
    %c0_16 = arith.constant 0 : index
    %62 = vector.load %arg4[%61, %c0_15, %c0_16] : memref<4x2x32xf32, #tpu.memory_space<vmem>>, vector<1x2x32xf32>
    %63 = vector.shape_cast %62 : vector<1x2x32xf32> to vector<2x32xf32>
    %64 = vector.shape_cast %50 : vector<2x32xf32> to vector<1x2x32xf32>
    tpu.vector_store %arg4[%61, %c0_15, %c0_16], %64 {strides = array<i32>} : memref<4x2x32xf32, #tpu.memory_space<vmem>>, vector<1x2x32xf32>,
    %65 = arith.index_cast %20 : i32 to index
    %c0_17 = arith.constant 0 : index
    %c0_18 = arith.constant 0 : index
    %66 = vector.load %arg5[%65, %c0_17, %c0_18] : memref<4x2x32xf32, #tpu.memory_space<vmem>>, vector<1x2x32xf32>
    %67 = vector.shape_cast %66 : vector<1x2x32xf32> to vector<2x32xf32>
    %68 = vector.shape_cast %60 : vector<2x32xf32> to vector<1x2x32xf32>
    tpu.vector_store %arg5[%65, %c0_17, %c0_18], %68 {strides = array<i32>} : memref<4x2x32xf32, #tpu.memory_space<vmem>>, vector<1x2x32xf32>,
    %69 = tpu.concatenate %50, %60 in 1 : vector<2x32xf32>, vector<2x32xf32> -> vector<2x64xf32>
    %70 = tpu.concatenate %48, %58 in 1 : vector<2x32xf32>, vector<2x32xf32> -> vector<2x64xf32>
    %c1_i32 = arith.constant 1 : i32
    %71 = arith.truncf %69 : vector<2x64xf32> to vector<2x64xbf16>
    %cst_19 = arith.constant dense<0.000000e+00> : vector<2x256xf32>
    %72 = tpu.matmul %71, %3, %cst_19 {dimension_numbers = #tpu.dot_dimension_numbers<[1], [0], [0], [1], [0, 0, 1, 1], [], []>} : vector<2x64xbf16>, vector<64x256xbf16>, vector<2x256xf32> -> vector<2x256xf32>
    %c3_i32_20 = arith.constant 3 : i32
    %73 = arith.subi %c3_i32_20, %c1_i32 : i32
    %74 = arith.index_cast %c1_i32 : i32 to index
    %c0_21 = arith.constant 0 : index
    %c0_22 = arith.constant 0 : index
    %75 = vector.load %arg1[%74, %c0_21, %c0_22] : memref<4x2x128xbf16, #tpu.memory_space<vmem>>, vector<1x2x128xbf16>
    %76 = vector.shape_cast %75 : vector<1x2x128xbf16> to vector<2x128xbf16>
    %77 = arith.extf %76 : vector<2x128xbf16> to vector<2x128xf32>
    %78 = vector.extract_strided_slice %72 {offsets = [0, 0], sizes = [2, 128], strides = [1, 1]} : vector<2x256xf32> to vector<2x128xf32>
    %79 = arith.addf %77, %78 : vector<2x128xf32>
    %80 = arith.mulf %79, %12 : vector<2x128xf32>
    %81 = math.tanh %80 : vector<2x128xf32>
    %82 = arith.mulf %81, %12 : vector<2x128xf32>
    %83 = arith.addf %82, %15 : vector<2x128xf32>
    %84 = arith.index_cast %73 : i32 to index
    %c0_23 = arith.constant 0 : index
    %c0_24 = arith.constant 0 : index
    %85 = vector.load %arg2[%84, %c0_23, %c0_24] : memref<4x2x128xbf16, #tpu.memory_space<vmem>>, vector<1x2x128xbf16>
    %86 = vector.shape_cast %85 : vector<1x2x128xbf16> to vector<2x128xbf16>
    %87 = arith.extf %86 : vector<2x128xbf16> to vector<2x128xf32>
    %88 = vector.extract_strided_slice %72 {offsets = [0, 128], sizes = [2, 128], strides = [1, 1]} : vector<2x256xf32> to vector<2x128xf32>
    %89 = arith.addf %87, %88 : vector<2x128xf32>
    %90 = arith.mulf %89, %12 : vector<2x128xf32>
    %91 = math.tanh %90 : vector<2x128xf32>
    %92 = arith.mulf %91, %12 : vector<2x128xf32>
    %93 = arith.addf %92, %15 : vector<2x128xf32>
    %94 = vector.extract_strided_slice %70 {offsets = [0, 0], sizes = [2, 32], strides = [1, 1]} : vector<2x64xf32> to vector<2x32xf32>
    %95 = vector.extract_strided_slice %83 {offsets = [0, 0], sizes = [2, 32], strides = [1, 1]} : vector<2x128xf32> to vector<2x32xf32>
    %96 = vector.extract_strided_slice %83 {offsets = [0, 32], sizes = [2, 32], strides = [1, 1]} : vector<2x128xf32> to vector<2x32xf32>
    %97 = vector.extract_strided_slice %83 {offsets = [0, 64], sizes = [2, 32], strides = [1, 1]} : vector<2x128xf32> to vector<2x32xf32>
    %98 = vector.extract_strided_slice %83 {offsets = [0, 96], sizes = [2, 32], strides = [1, 1]} : vector<2x128xf32> to vector<2x32xf32>
    %99 = arith.mulf %96, %94 : vector<2x32xf32>
    %100 = arith.mulf %95, %97 : vector<2x32xf32>
    %101 = arith.addf %99, %100 : vector<2x32xf32>
    %102 = math.tanh %101 : vector<2x32xf32>
    %103 = arith.mulf %98, %102 : vector<2x32xf32>
    %104 = vector.extract_strided_slice %70 {offsets = [0, 32], sizes = [2, 32], strides = [1, 1]} : vector<2x64xf32> to vector<2x32xf32>
    %105 = vector.extract_strided_slice %93 {offsets = [0, 0], sizes = [2, 32], strides = [1, 1]} : vector<2x128xf32> to vector<2x32xf32>
    %106 = vector.extract_strided_slice %93 {offsets = [0, 32], sizes = [2, 32], strides = [1, 1]} : vector<2x128xf32> to vector<2x32xf32>
    %107 = vector.extract_strided_slice %93 {offsets = [0, 64], sizes = [2, 32], strides = [1, 1]} : vector<2x128xf32> to vector<2x32xf32>
    %108 = vector.extract_strided_slice %93 {offsets = [0, 96], sizes = [2, 32], strides = [1, 1]} : vector<2x128xf32> to vector<2x32xf32>
    %109 = arith.mulf %106, %104 : vector<2x32xf32>
    %110 = arith.mulf %105, %107 : vector<2x32xf32>
    %111 = arith.addf %109, %110 : vector<2x32xf32>
    %112 = math.tanh %111 : vector<2x32xf32>
    %113 = arith.mulf %108, %112 : vector<2x32xf32>
    %114 = arith.index_cast %c1_i32 : i32 to index
    %c0_25 = arith.constant 0 : index
    %c0_26 = arith.constant 0 : index
    %115 = vector.load %arg4[%114, %c0_25, %c0_26] : memref<4x2x32xf32, #tpu.memory_space<vmem>>, vector<1x2x32xf32>
    %116 = vector.shape_cast %115 : vector<1x2x32xf32> to vector<2x32xf32>
    %117 = vector.shape_cast %103 : vector<2x32xf32> to vector<1x2x32xf32>
    tpu.vector_store %arg4[%114, %c0_25, %c0_26], %117 {strides = array<i32>} : memref<4x2x32xf32, #tpu.memory_space<vmem>>, vector<1x2x32xf32>,
    %118 = arith.index_cast %73 : i32 to index
    %c0_27 = arith.constant 0 : index
    %c0_28 = arith.constant 0 : index
    %119 = vector.load %arg5[%118, %c0_27, %c0_28] : memref<4x2x32xf32, #tpu.memory_space<vmem>>, vector<1x2x32xf32>
    %120 = vector.shape_cast %119 : vector<1x2x32xf32> to vector<2x32xf32>
    %121 = vector.shape_cast %113 : vector<2x32xf32> to vector<1x2x32xf32>
    tpu.vector_store %arg5[%118, %c0_27, %c0_28], %121 {strides = array<i32>} : memref<4x2x32xf32, #tpu.memory_space<vmem>>, vector<1x2x32xf32>,
    %122 = tpu.concatenate %103, %113 in 1 : vector<2x32xf32>, vector<2x32xf32> -> vector<2x64xf32>
    %123 = tpu.concatenate %101, %111 in 1 : vector<2x32xf32>, vector<2x32xf32> -> vector<2x64xf32>
    %c2_i32 = arith.constant 2 : i32
    %124 = arith.truncf %122 : vector<2x64xf32> to vector<2x64xbf16>
    %cst_29 = arith.constant dense<0.000000e+00> : vector<2x256xf32>
    %125 = tpu.matmul %124, %3, %cst_29 {dimension_numbers = #tpu.dot_dimension_numbers<[1], [0], [0], [1], [0, 0, 1, 1], [], []>} : vector<2x64xbf16>, vector<64x256xbf16>, vector<2x256xf32> -> vector<2x256xf32>
    %c3_i32_30 = arith.constant 3 : i32
    %126 = arith.subi %c3_i32_30, %c2_i32 : i32
    %127 = arith.index_cast %c2_i32 : i32 to index
    %c0_31 = arith.constant 0 : index
    %c0_32 = arith.constant 0 : index
    %128 = vector.load %arg1[%127, %c0_31, %c0_32] : memref<4x2x128xbf16, #tpu.memory_space<vmem>>, vector<1x2x128xbf16>
    %129 = vector.shape_cast %128 : vector<1x2x128xbf16> to vector<2x128xbf16>
    %130 = arith.extf %129 : vector<2x128xbf16> to vector<2x128xf32>
    %131 = vector.extract_strided_slice %125 {offsets = [0, 0], sizes = [2, 128], strides = [1, 1]} : vector<2x256xf32> to vector<2x128xf32>
    %132 = arith.addf %130, %131 : vector<2x128xf32>
    %133 = arith.mulf %132, %12 : vector<2x128xf32>
    %134 = math.tanh %133 : vector<2x128xf32>
    %135 = arith.mulf %134, %12 : vector<2x128xf32>
    %136 = arith.addf %135, %15 : vector<2x128xf32>
    %137 = arith.index_cast %126 : i32 to index
    %c0_33 = arith.constant 0 : index
    %c0_34 = arith.constant 0 : index
    %138 = vector.load %arg2[%137, %c0_33, %c0_34] : memref<4x2x128xbf16, #tpu.memory_space<vmem>>, vector<1x2x128xbf16>
    %139 = vector.shape_cast %138 : vector<1x2x128xbf16> to vector<2x128xbf16>
    %140 = arith.extf %139 : vector<2x128xbf16> to vector<2x128xf32>
    %141 = vector.extract_strided_slice %125 {offsets = [0, 128], sizes = [2, 128], strides = [1, 1]} : vector<2x256xf32> to vector<2x128xf32>
    %142 = arith.addf %140, %141 : vector<2x128xf32>
    %143 = arith.mulf %142, %12 : vector<2x128xf32>
    %144 = math.tanh %143 : vector<2x128xf32>
    %145 = arith.mulf %144, %12 : vector<2x128xf32>
    %146 = arith.addf %145, %15 : vector<2x128xf32>
    %147 = vector.extract_strided_slice %123 {offsets = [0, 0], sizes = [2, 32], strides = [1, 1]} : vector<2x64xf32> to vector<2x32xf32>
    %148 = vector.extract_strided_slice %136 {offsets = [0, 0], sizes = [2, 32], strides = [1, 1]} : vector<2x128xf32> to vector<2x32xf32>
    %149 = vector.extract_strided_slice %136 {offsets = [0, 32], sizes = [2, 32], strides = [1, 1]} : vector<2x128xf32> to vector<2x32xf32>
    %150 = vector.extract_strided_slice %136 {offsets = [0, 64], sizes = [2, 32], strides = [1, 1]} : vector<2x128xf32> to vector<2x32xf32>
    %151 = vector.extract_strided_slice %136 {offsets = [0, 96], sizes = [2, 32], strides = [1, 1]} : vector<2x128xf32> to vector<2x32xf32>
    %152 = arith.mulf %149, %147 : vector<2x32xf32>
    %153 = arith.mulf %148, %150 : vector<2x32xf32>
    %154 = arith.addf %152, %153 : vector<2x32xf32>
    %155 = math.tanh %154 : vector<2x32xf32>
    %156 = arith.mulf %151, %155 : vector<2x32xf32>
    %157 = vector.extract_strided_slice %123 {offsets = [0, 32], sizes = [2, 32], strides = [1, 1]} : vector<2x64xf32> to vector<2x32xf32>
    %158 = vector.extract_strided_slice %146 {offsets = [0, 0], sizes = [2, 32], strides = [1, 1]} : vector<2x128xf32> to vector<2x32xf32>
    %159 = vector.extract_strided_slice %146 {offsets = [0, 32], sizes = [2, 32], strides = [1, 1]} : vector<2x128xf32> to vector<2x32xf32>
    %160 = vector.extract_strided_slice %146 {offsets = [0, 64], sizes = [2, 32], strides = [1, 1]} : vector<2x128xf32> to vector<2x32xf32>
    %161 = vector.extract_strided_slice %146 {offsets = [0, 96], sizes = [2, 32], strides = [1, 1]} : vector<2x128xf32> to vector<2x32xf32>
    %162 = arith.mulf %159, %157 : vector<2x32xf32>
    %163 = arith.mulf %158, %160 : vector<2x32xf32>
    %164 = arith.addf %162, %163 : vector<2x32xf32>
    %165 = math.tanh %164 : vector<2x32xf32>
    %166 = arith.mulf %161, %165 : vector<2x32xf32>
    %167 = arith.index_cast %c2_i32 : i32 to index
    %c0_35 = arith.constant 0 : index
    %c0_36 = arith.constant 0 : index
    %168 = vector.load %arg4[%167, %c0_35, %c0_36] : memref<4x2x32xf32, #tpu.memory_space<vmem>>, vector<1x2x32xf32>
    %169 = vector.shape_cast %168 : vector<1x2x32xf32> to vector<2x32xf32>
    %170 = vector.shape_cast %156 : vector<2x32xf32> to vector<1x2x32xf32>
    tpu.vector_store %arg4[%167, %c0_35, %c0_36], %170 {strides = array<i32>} : memref<4x2x32xf32, #tpu.memory_space<vmem>>, vector<1x2x32xf32>,
    %171 = arith.index_cast %126 : i32 to index
    %c0_37 = arith.constant 0 : index
    %c0_38 = arith.constant 0 : index
    %172 = vector.load %arg5[%171, %c0_37, %c0_38] : memref<4x2x32xf32, #tpu.memory_space<vmem>>, vector<1x2x32xf32>
    %173 = vector.shape_cast %172 : vector<1x2x32xf32> to vector<2x32xf32>
    %174 = vector.shape_cast %166 : vector<2x32xf32> to vector<1x2x32xf32>
    tpu.vector_store %arg5[%171, %c0_37, %c0_38], %174 {strides = array<i32>} : memref<4x2x32xf32, #tpu.memory_space<vmem>>, vector<1x2x32xf32>,
    %175 = tpu.concatenate %156, %166 in 1 : vector<2x32xf32>, vector<2x32xf32> -> vector<2x64xf32>
    %176 = tpu.concatenate %154, %164 in 1 : vector<2x32xf32>, vector<2x32xf32> -> vector<2x64xf32>
    %c3_i32_39 = arith.constant 3 : i32
    %177 = arith.truncf %175 : vector<2x64xf32> to vector<2x64xbf16>
    %cst_40 = arith.constant dense<0.000000e+00> : vector<2x256xf32>
    %178 = tpu.matmul %177, %3, %cst_40 {dimension_numbers = #tpu.dot_dimension_numbers<[1], [0], [0], [1], [0, 0, 1, 1], [], []>} : vector<2x64xbf16>, vector<64x256xbf16>, vector<2x256xf32> -> vector<2x256xf32>
    %c3_i32_41 = arith.constant 3 : i32
    %179 = arith.subi %c3_i32_41, %c3_i32_39 : i32
    %180 = arith.index_cast %c3_i32_39 : i32 to index
    %c0_42 = arith.constant 0 : index
    %c0_43 = arith.constant 0 : index
    %181 = vector.load %arg1[%180, %c0_42, %c0_43] : memref<4x2x128xbf16, #tpu.memory_space<vmem>>, vector<1x2x128xbf16>
    %182 = vector.shape_cast %181 : vector<1x2x128xbf16> to vector<2x128xbf16>
    %183 = arith.extf %182 : vector<2x128xbf16> to vector<2x128xf32>
    %184 = vector.extract_strided_slice %178 {offsets = [0, 0], sizes = [2, 128], strides = [1, 1]} : vector<2x256xf32> to vector<2x128xf32>
    %185 = arith.addf %183, %184 : vector<2x128xf32>
    %186 = arith.mulf %185, %12 : vector<2x128xf32>
    %187 = math.tanh %186 : vector<2x128xf32>
    %188 = arith.mulf %187, %12 : vector<2x128xf32>
    %189 = arith.addf %188, %15 : vector<2x128xf32>
    %190 = arith.index_cast %179 : i32 to index
    %c0_44 = arith.constant 0 : index
    %c0_45 = arith.constant 0 : index
    %191 = vector.load %arg2[%190, %c0_44, %c0_45] : memref<4x2x128xbf16, #tpu.memory_space<vmem>>, vector<1x2x128xbf16>
    %192 = vector.shape_cast %191 : vector<1x2x128xbf16> to vector<2x128xbf16>
    %193 = arith.extf %192 : vector<2x128xbf16> to vector<2x128xf32>
    %194 = vector.extract_strided_slice %178 {offsets = [0, 128], sizes = [2, 128], strides = [1, 1]} : vector<2x256xf32> to vector<2x128xf32>
    %195 = arith.addf %193, %194 : vector<2x128xf32>
    %196 = arith.mulf %195, %12 : vector<2x128xf32>
    %197 = math.tanh %196 : vector<2x128xf32>
    %198 = arith.mulf %197, %12 : vector<2x128xf32>
    %199 = arith.addf %198, %15 : vector<2x128xf32>
    %200 = vector.extract_strided_slice %176 {offsets = [0, 0], sizes = [2, 32], strides = [1, 1]} : vector<2x64xf32> to vector<2x32xf32>
    %201 = vector.extract_strided_slice %189 {offsets = [0, 0], sizes = [2, 32], strides = [1, 1]} : vector<2x128xf32> to vector<2x32xf32>
    %202 = vector.extract_strided_slice %189 {offsets = [0, 32], sizes = [2, 32], strides = [1, 1]} : vector<2x128xf32> to vector<2x32xf32>
    %203 = vector.extract_strided_slice %189 {offsets = [0, 64], sizes = [2, 32], strides = [1, 1]} : vector<2x128xf32> to vector<2x32xf32>
    %204 = vector.extract_strided_slice %189 {offsets = [0, 96], sizes = [2, 32], strides = [1, 1]} : vector<2x128xf32> to vector<2x32xf32>
    %205 = arith.mulf %202, %200 : vector<2x32xf32>
    %206 = arith.mulf %201, %203 : vector<2x32xf32>
    %207 = arith.addf %205, %206 : vector<2x32xf32>
    %208 = math.tanh %207 : vector<2x32xf32>
    %209 = arith.mulf %204, %208 : vector<2x32xf32>
    %210 = vector.extract_strided_slice %176 {offsets = [0, 32], sizes = [2, 32], strides = [1, 1]} : vector<2x64xf32> to vector<2x32xf32>
    %211 = vector.extract_strided_slice %199 {offsets = [0, 0], sizes = [2, 32], strides = [1, 1]} : vector<2x128xf32> to vector<2x32xf32>
    %212 = vector.extract_strided_slice %199 {offsets = [0, 32], sizes = [2, 32], strides = [1, 1]} : vector<2x128xf32> to vector<2x32xf32>
    %213 = vector.extract_strided_slice %199 {offsets = [0, 64], sizes = [2, 32], strides = [1, 1]} : vector<2x128xf32> to vector<2x32xf32>
    %214 = vector.extract_strided_slice %199 {offsets = [0, 96], sizes = [2, 32], strides = [1, 1]} : vector<2x128xf32> to vector<2x32xf32>
    %215 = arith.mulf %212, %210 : vector<2x32xf32>
    %216 = arith.mulf %211, %213 : vector<2x32xf32>
    %217 = arith.addf %215, %216 : vector<2x32xf32>
    %218 = math.tanh %217 : vector<2x32xf32>
    %219 = arith.mulf %214, %218 : vector<2x32xf32>
    %220 = arith.index_cast %c3_i32_39 : i32 to index
    %c0_46 = arith.constant 0 : index
    %c0_47 = arith.constant 0 : index
    %221 = vector.load %arg4[%220, %c0_46, %c0_47] : memref<4x2x32xf32, #tpu.memory_space<vmem>>, vector<1x2x32xf32>
    %222 = vector.shape_cast %221 : vector<1x2x32xf32> to vector<2x32xf32>
    %223 = vector.shape_cast %209 : vector<2x32xf32> to vector<1x2x32xf32>
    tpu.vector_store %arg4[%220, %c0_46, %c0_47], %223 {strides = array<i32>} : memref<4x2x32xf32, #tpu.memory_space<vmem>>, vector<1x2x32xf32>,
    %224 = arith.index_cast %179 : i32 to index
    %c0_48 = arith.constant 0 : index
    %c0_49 = arith.constant 0 : index
    %225 = vector.load %arg5[%224, %c0_48, %c0_49] : memref<4x2x32xf32, #tpu.memory_space<vmem>>, vector<1x2x32xf32>
    %226 = vector.shape_cast %225 : vector<1x2x32xf32> to vector<2x32xf32>
    %227 = vector.shape_cast %219 : vector<2x32xf32> to vector<1x2x32xf32>
    tpu.vector_store %arg5[%224, %c0_48, %c0_49], %227 {strides = array<i32>} : memref<4x2x32xf32, #tpu.memory_space<vmem>>, vector<1x2x32xf32>,
    %228 = tpu.concatenate %209, %219 in 1 : vector<2x32xf32>, vector<2x32xf32> -> vector<2x64xf32>
    %229 = tpu.concatenate %207, %217 in 1 : vector<2x32xf32>, vector<2x32xf32> -> vector<2x64xf32>
    %c4_i32 = arith.constant 4 : i32
    %c0_50 = arith.constant 0 : index
    %c0_51 = arith.constant 0 : index
    %230 = vector.load %arg8[%c0_50, %c0_51] : memref<2x64xf32, #tpu.memory_space<vmem>>, vector<2x64xf32>
    tpu.vector_store %arg8[%c0_50, %c0_51], %228 {strides = array<i32>} : memref<2x64xf32, #tpu.memory_space<vmem>>, vector<2x64xf32>,
    %c0_52 = arith.constant 0 : index
    %c0_53 = arith.constant 0 : index
    %231 = vector.load %arg9[%c0_52, %c0_53] : memref<2x64xf32, #tpu.memory_space<vmem>>, vector<2x64xf32>
    tpu.vector_store %arg9[%c0_52, %c0_53], %229 {strides = array<i32>} : memref<2x64xf32, #tpu.memory_space<vmem>>, vector<2x64xf32>,
    %c1_i32_54 = arith.constant 1 : i32
    %232 = arith.cmpi eq, %arg0, %c1_i32_54 : i32
    %233 = arith.extui %232 : i1 to i32
    %c0_i32_55 = arith.constant 0 : i32
    %234 = arith.cmpi ne, %233, %c0_i32_55 : i32
    scf.if %234 {
      %235 = vector.extract_strided_slice %228 {offsets = [0, 0], sizes = [2, 32], strides = [1, 1]} : vector<2x64xf32> to vector<2x32xf32>
      %c0_56 = arith.constant 0 : index
      %c0_57 = arith.constant 0 : index
      %c0_58 = arith.constant 0 : index
      %236 = vector.load %arg6[%c0_56, %c0_57, %c0_58] : memref<2x2x32xf32, #tpu.memory_space<vmem>>, vector<1x2x32xf32>
      %237 = vector.shape_cast %236 : vector<1x2x32xf32> to vector<2x32xf32>
      %238 = vector.shape_cast %235 : vector<2x32xf32> to vector<1x2x32xf32>
      tpu.vector_store %arg6[%c0_56, %c0_57, %c0_58], %238 {strides = array<i32>} : memref<2x2x32xf32, #tpu.memory_space<vmem>>, vector<1x2x32xf32>,
      %239 = vector.extract_strided_slice %228 {offsets = [0, 32], sizes = [2, 32], strides = [1, 1]} : vector<2x64xf32> to vector<2x32xf32>
      %c1 = arith.constant 1 : index
      %c0_59 = arith.constant 0 : index
      %c0_60 = arith.constant 0 : index
      %240 = vector.load %arg6[%c1, %c0_59, %c0_60] : memref<2x2x32xf32, #tpu.memory_space<vmem>>, vector<1x2x32xf32>
      %241 = vector.shape_cast %240 : vector<1x2x32xf32> to vector<2x32xf32>
      %242 = vector.shape_cast %239 : vector<2x32xf32> to vector<1x2x32xf32>
      tpu.vector_store %arg6[%c1, %c0_59, %c0_60], %242 {strides = array<i32>} : memref<2x2x32xf32, #tpu.memory_space<vmem>>, vector<1x2x32xf32>,
      %243 = vector.extract_strided_slice %229 {offsets = [0, 0], sizes = [2, 32], strides = [1, 1]} : vector<2x64xf32> to vector<2x32xf32>
      %c0_61 = arith.constant 0 : index
      %c0_62 = arith.constant 0 : index
      %c0_63 = arith.constant 0 : index
      %244 = vector.load %arg7[%c0_61, %c0_62, %c0_63] : memref<2x2x32xf32, #tpu.memory_space<vmem>>, vector<1x2x32xf32>
      %245 = vector.shape_cast %244 : vector<1x2x32xf32> to vector<2x32xf32>
      %246 = vector.shape_cast %243 : vector<2x32xf32> to vector<1x2x32xf32>
      tpu.vector_store %arg7[%c0_61, %c0_62, %c0_63], %246 {strides = array<i32>} : memref<2x2x32xf32, #tpu.memory_space<vmem>>, vector<1x2x32xf32>,
      %247 = vector.extract_strided_slice %229 {offsets = [0, 32], sizes = [2, 32], strides = [1, 1]} : vector<2x64xf32> to vector<2x32xf32>
      %c1_64 = arith.constant 1 : index
      %c0_65 = arith.constant 0 : index
      %c0_66 = arith.constant 0 : index
      %248 = vector.load %arg7[%c1_64, %c0_65, %c0_66] : memref<2x2x32xf32, #tpu.memory_space<vmem>>, vector<1x2x32xf32>
      %249 = vector.shape_cast %248 : vector<1x2x32xf32> to vector<2x32xf32>
      %250 = vector.shape_cast %247 : vector<2x32xf32> to vector<1x2x32xf32>
      tpu.vector_store %arg7[%c1_64, %c0_65, %c0_66], %250 {strides = array<i32>} : memref<2x2x32xf32, #tpu.memory_space<vmem>>, vector<1x2x32xf32>,
    } else {
    }
    return
  }
  func.func @transform_0(%arg0: i32) -> (i32, i32, i32) {
    %c0_i32 = arith.constant 0 : i32
    %c0_i32_0 = arith.constant 0 : i32
    %c0_i32_1 = arith.constant 0 : i32
    return %arg0, %c0_i32, %c0_i32_0 : i32, i32, i32
  }
  func.func @transform_1(%arg0: i32) -> (i32, i32, i32) {
    %c1_i32 = arith.constant 1 : i32
    %0 = arith.subi %c1_i32, %arg0 : i32
    %c0_i32 = arith.constant 0 : i32
    %c0_i32_0 = arith.constant 0 : i32
    %c0_i32_1 = arith.constant 0 : i32
    return %0, %c0_i32, %c0_i32_0 : i32, i32, i32
  }
  func.func @transform_2(%arg0: i32) -> (i32, i32) {
    %c0_i32 = arith.constant 0 : i32
    %c0_i32_0 = arith.constant 0 : i32
    %c0_i32_1 = arith.constant 0 : i32
    return %c0_i32, %c0_i32_0 : i32, i32
  }
  func.func @transform_3(%arg0: i32) -> (i32, i32, i32) {
    %c0_i32 = arith.constant 0 : i32
    %c0_i32_0 = arith.constant 0 : i32
    %c0_i32_1 = arith.constant 0 : i32
    return %arg0, %c0_i32, %c0_i32_0 : i32, i32, i32
  }
  func.func @transform_4(%arg0: i32) -> (i32, i32, i32) {
    %c1_i32 = arith.constant 1 : i32
    %0 = arith.subi %c1_i32, %arg0 : i32
    %c0_i32 = arith.constant 0 : i32
    %c0_i32_0 = arith.constant 0 : i32
    %c0_i32_1 = arith.constant 0 : i32
    return %0, %c0_i32, %c0_i32_0 : i32, i32, i32
  }
  func.func @transform_5(%arg0: i32) -> (i32, i32, i32) {
    %c0_i32 = arith.constant 0 : i32
    %c0_i32_0 = arith.constant 0 : i32
    %c0_i32_1 = arith.constant 0 : i32
    %c0_i32_2 = arith.constant 0 : i32
    return %c0_i32, %c0_i32_0, %c0_i32_1 : i32, i32, i32
  }
  func.func @transform_6(%arg0: i32) -> (i32, i32, i32) {
    %c0_i32 = arith.constant 0 : i32
    %c0_i32_0 = arith.constant 0 : i32
    %c0_i32_1 = arith.constant 0 : i32
    %c0_i32_2 = arith.constant 0 : i32
    return %c0_i32, %c0_i32_0, %c0_i32_1 : i32, i32, i32
  }
}

</mosaic_0001>

<bundles_post_ra>
// kernel: my_model_forward.2
= control target key start
LH: loop header
LB: loop body
LE: loop exit
PB: predicated region body
PF: predicated region fallthrough
CT: control target
= control target key end

     0   :  { %s1231_s21 = smov 0   ;;  %s1500_s0 = inlined_call_operand.vmem [shape: bf16[8,2,128], index: 0, kind: input, shape index: {}]   ;;  %s1501_s1 = inlined_call_operand.vmem [shape: bf16[8,2,128], index: 1, kind: input, shape index: {}]   ;;  %s1502_s2 = inlined_call_operand.vmem [shape: bf16[64,256], index: 2, kind: input, shape index: {}]   ;;  %s1503_s3 = inlined_call_operand.vmem [shape: f32[8,2,32], index: 3, kind: output, shape index: {0}]   ;;  %s1504_s4 = inlined_call_operand.vmem [shape: f32[8,2,32], index: 4, kind: output, shape index: {1}]   ;;  %s1505_s5 = inlined_call_operand.vmem [shape: f32[2,2,32], index: 5, kind: output, shape index: {2}]   ;;  %s1506_s6 = inlined_call_operand.vmem [shape: f32[2,2,32], index: 6, kind: output, shape index: {3}]  }
   0x1 LB: > { %s1237_s22 = sadd.s32 4294967295, %s1186_s21   ;;  %p1083_p0 = scmp.ge.s32.totalorder %s1186_s21, 1  ;;  %s1186_s21 = sphi %s1231_s21, %s17_s21  }
   0x2   : > { %p225_p1 = scmp.lt.s32.totalorder %s1186_s21, 3 }
   0x4   : > { %p226_p2 = pnand %p1083_p0, %p225_p1 }
   0x5   : > { %s1084_s23 = sshll.u32 (!%p226_p2), %s1237_s22, 2  ;;  %s270_s24 = ssub.s32 (!%p226_p2), 1, %s1237_s22 }
   0x6   : > { %229 = sbr.rel (%p226_p2) target bundleno = 2971 (0xb9b), region = 32  ;;  %p266_p3 = scmp.lt.s32.totalorder (!%p226_p2), %s1084_s23, 7 }
   0x7   : > { %s1085_s25 = sshll.u32 (!%p226_p2), %s270_s24, 2  ;;  %p1090_p5 = scmp.ne.s32.totalorder (!%p226_p2), %s1237_s22, 0 }
   0x8   : > { %p272_p4 = scmp.lt.s32.totalorder (!%p226_p2), %s1085_s25, 7 }
   0xb   : > { %s1510_s23 = smov (!%p266_p3, %s1084_s23), 7  ;;  %s1512_s25 = smov (!%p272_p4, %s1085_s25), 7 }
   0xc   : > { %s1246_s28 = scalar_lea.vmem %s1500_s0, %s1510_s23  ;;  %s1087_s29 = sshll.u32 %s1510_s23, 1 }
   0xd   : > { %s1251_s8 = scalar_lea.vmem %s1501_s1, %s1512_s25  ;;  %s1256_s11 = scalar_lea.vmem %s1503_s3, %s1087_s29 }
   0xe   : > { %s1089_s12 = sshll.u32 %s1512_s25, 1  ;;  %295 = sbr.rel (%p1090_p5) target bundleno = 21 (0x15), region = 36 }
   0xf   : > { %s1261_s15 = scalar_lea.vmem %s1504_s4, %s1089_s12 }
  0x13   : > { %vm296_vm0 = vcmask 517120   ;;  %v1188_v0 = vmov 0.0  }
  0x14   : > { %297 = vst.msk [vmem:[#allocation2] sm:$0x3] %vm296_vm0, %v1188_v0  ;;  %298 = vst.msk [vmem:[#allocation3] sm:$0x3] %vm296_vm0, %v1188_v0 }
  0x15 PF: > { %v1136_v1 = vld [vmem:[%s1502_s2 + $0x34] ss:$8 sps:$4 sm:$0xff]   ;;  %v307_v2 = vlaneseq  ;;  %v1270_v3 = vld [vmem:[%s1502_s2 + $0x30] ss:$8 sps:$4 sm:$0xff]   ;;  %v1189_v4 = vmov 0   ;;  %s1191_s10 = smov 32  }
  0x16   : > { %393 = vmatprep.mubr.bf16.mxu0 %v1189_v4  ;;  %541 = vmatprep.mubr.bf16.mxu1 %v1189_v4  ;;  %v1277_v5 = vld [vmem:[%s1502_s2 + $0x24] ss:$8 sps:$4 sm:$0xff]   ;;  %v1190_v6 = vmov 1983009808   ;;  %v1283_v9 = vld [vmem:[%s1502_s2 + $0x20] ss:$8 sps:$4 sm:$0xff]  }
  0x17   : > { %369 = vmatprep.subr.bf16.mxu0 %v1136_v1  ;;  %v419_v7 = vunpack.c.l.s4 %v1190_v6  ;;  %v422_v8 = vshrl.u32 %v307_v2, 7  ;;  %517 = vmatprep.subr.bf16.mxu1 %v1136_v1  ;;  %v1290_v10 = vld [vmem:[%s1502_s2 + $0x14] ss:$8 sps:$4 sm:$0xff]   ;;  %v1301_v14 = vld [vmem:[%s1502_s2 + $0x10] ss:$8 sps:$4 sm:$0xff]   ;;  %vm357_vm1 = vcmask 523264  }
  0x18   : > { %370 = vmatpush1.bf16.msra.mxu0 %v1270_v3  ;;  %518 = vmatpush1.bf16.msra.mxu1 %v1270_v3  ;;  %v1308_v15 = vld [vmem:[%s1502_s2 + $0x4] ss:$8 sps:$4 sm:$0xff]   ;;  %v1318_v17 = vld [vmem:[%s1502_s2] ss:$8 sps:$4 sm:$0xff]   ;;  %v308_v20 = vand.u32 127, %v307_v2  ;;  %v1192_v26 = vmov 0.5  }
  0x19   : > { %371 = vmatprep.subr.bf16.mxu0 %v1277_v5  ;;  %v420_v11 = vunpack.c.0.s8 %v419_v7  ;;  %519 = vmatprep.subr.bf16.mxu1 %v1277_v5  ;;  %v402_v21 = vld [vmem:[%s1246_s28] sm:$0x1]  ;;  %v1100_v22 = vld [vmem:[%s1251_s8 + $0x3] sm:$0x1]  ;;  %s1193_s14 = smov 64   ;;  %s1194_s16 = smov 96  }
  0x1a   : > { %vm309_vm2 = vcmp.ge.s32.totalorder %v308_v20, 64  ;;  %vm310_vm3 = vcmp.lt.s32.totalorder %v308_v20, 96  ;;  %v403_v24 = vunpack.c.l.bf16 %v402_v21  ;;  %v411_v25 = vunpack.c.l.bf16 %v1100_v22  ;;  %v1103_v6 = vld [vmem:[%s1246_s28 + $0x1] sm:$0x1]  ;;  %v1104_v7 = vld [vmem:[%s1251_s8 + $0x2] sm:$0x1] }
  0x1b   : > { %v1293_v12 = vld [vmem:[#allocation3] sm:$0x3]  ;;  %v1295_v13 = vsub.s32 %v420_v11, %v422_v8  ;;  %v314_v18 = vld [vmem:[#allocation2] sm:$0x3]  ;;  %vm1336_vm4 = vmand %vm309_vm2, %vm310_vm3  ;;  %vm473_vm5 = vcmask 254976   ;;  %vm491_vm6 = vcmask 261120   ;;  %v552_v8 = vunpack.c.l.bf16 %v1103_v6 }
  0x1c   : > { %372 = vmatpush1.bf16.msra.mxu0 %v1283_v9  ;;  %520 = vmatpush1.bf16.msra.mxu1 %v1283_v9  ;;  %v316_v19 = vpack.c.bf16 %v314_v18, %v314_v18  ;;  %v1342_v27 = vsel %vm1336_vm4, 1.0, %v1192_v26  ;;  %v1348_v37 = vsel %vm1336_vm4, 0.0, %v1192_v26  ;;  %v560_v11 = vunpack.c.l.bf16 %v1104_v7  ;;  %p1115_p6 = scmp.ne.s32.totalorder %s1237_s22, 1 }
  0x1d   : > { %373 = vmatprep.subr.bf16.mxu0 %v1290_v10  ;;  %v424_v16 = vrot.slane %v1293_v12, %v1295_v13  ;;  %521 = vmatprep.subr.bf16.mxu1 %v1290_v10  ;;  %vm947_vm7 = vcmask 517120   ;;  %s1195_s18 = smov (!%p1115_p6), 96  }
  0x1f   : > { %425 = vrot.lane.b32.xlu1 %v424_v16, %s1191_s10 }
  0x20   : > { %374 = vmatpush1.bf16.msra.mxu0 %v1301_v14  ;;  %522 = vmatpush1.bf16.msra.mxu1 %v1301_v14 }
  0x21   : > { %375 = vmatprep.subr.bf16.mxu0 %v1308_v15  ;;  %523 = vmatprep.subr.bf16.mxu1 %v1308_v15 }
  0x24   : > { %376 = vmatpush1.bf16.msra.mxu0 %v1318_v17  ;;  %524 = vmatpush1.bf16.msra.mxu1 %v1318_v17 }
  0x25   : > { %665 = vmatprep.subr.bf16.mxu0 %v1136_v1  ;;  %813 = vmatprep.subr.bf16.mxu1 %v1136_v1 }
  0x27   : > { %1099 = vmatmul.mubr.msk.bf16.vlgmr.msra.gmra.mxu0 %vm357_vm1, %v316_v19 }
  0x28   : > { %666 = vmatpush1.bf16.msra.mxu0 %v1270_v3  ;;  %689 = vmatprep.mubr.bf16.mxu0 %v1189_v4 }
  0x29   : > { %667 = vmatprep.subr.bf16.mxu0 %v1277_v5 }
  0x2c   : > { %668 = vmatpush1.bf16.msra.mxu0 %v1283_v9 }
  0x2d   : > { %669 = vmatprep.subr.bf16.mxu0 %v1290_v10 }
  0x30   : > { %670 = vmatpush1.bf16.msra.mxu0 %v1301_v14 }
  0x31   : > { %671 = vmatprep.subr.bf16.mxu0 %v1308_v15 }
  0x34   : > { %672 = vmatpush1.bf16.msra.mxu0 %v1318_v17 }
  0x91   : > { %v426_v47 = vpop.permute.xlu1 %425 }
  0xe7   : > { %v395_v28 = vpop.f32.mrf.mxu0 }
  0xe8   : > { %v404_v29 = vadd.f32 %v403_v24, %v395_v28 }
  0xe9   : > { %v397_v30 = vpop.f32.mrf.mxu0 }
  0xea   : > { %v405_v31 = vmul.f32 %v404_v29, %v1342_v27  ;;  %v412_v32 = vadd.f32 %v411_v25, %v397_v30 }
  0xeb   : > { %v399_v33 = vpop.f32.mrf.mxu0 }
  0xec   : > { %1148 = vtanh.f32 %v405_v31  ;;  %v413_v34 = vmul.f32 %v412_v32, %v1342_v27 }
  0xed   : > { %v400_v35 = vpop.f32.mrf.mxu0 }
  0xee   : > { %1150 = vtanh.f32 %v413_v34 }
  0xf9   : > { %v1149_v36 = vpop.eup %1148 }
  0xfa   : > { %v407_v38 = vmul.f32 %v1149_v36, %v1342_v27 }
  0xfb   : > { %v1151_v39 = vpop.eup %1150 }
  0xfc   : > { %v408_v40 = vadd.f32 %v407_v38, %v1348_v37  ;;  %v415_v41 = vmul.f32 %v1151_v39, %v1342_v27 }
  0xfe   : > { %430 = vrot.lane.b32.xlu0 %v408_v40, %s1193_s14  ;;  %v416_v42 = vadd.f32 %v415_v41, %v1348_v37  ;;  %v428_v48 = vmul.f32 %v426_v47, %v408_v40 }
 0x100   : > { %v445_v51 = vmul.f32 %v416_v42, %v1293_v12 }
 0x102   : > { %447 = vrot.lane.b32.xlu0 %v416_v42, %s1193_s14 }
 0x170   : > { %v431_v43 = vpop.permute.xlu0 %430 }
 0x171   : > { %v433_v44 = vmul.f32 %v431_v43, %v408_v40 }
 0x173   : > { %435 = vrot.lane.b32.xlu1 %v433_v44, %s1191_s10 }
 0x174   : > { %v448_v45 = vpop.permute.xlu0 %447 }
 0x175   : > { %v450_v46 = vmul.f32 %v448_v45, %v416_v42 }
 0x177   : > { %452 = vrot.lane.b32.xlu0 %v450_v46, %s1191_s10 }
 0x1e5   : > { %v436_v49 = vpop.permute.xlu1 %435 }
 0x1e6   : > { %v438_v50 = vadd.f32 %v436_v49, %v428_v48 }
 0x1e8   : > { %1152 = vtanh.f32 %v438_v50  ;;  %v500_v61 = vrot.slane %v438_v50, %v1295_v13 }
 0x1e9   : > { %v453_v52 = vpop.permute.xlu0 %452 }
 0x1ea   : > { %v455_v53 = vadd.f32 %v453_v52, %v445_v51  ;;  %v1108_v51 = vld [vmem:[%s1246_s28 + $0x2] sm:$0x1]  ;;  %v1109_v52 = vld [vmem:[%s1251_s8 + $0x1] sm:$0x1] }
 0x1ec   : > { %1154 = vtanh.f32 %v455_v53 }
 0x1f5   : > { %v1153_v54 = vpop.eup %1152 }
 0x1f6   : > { %441 = vrot.lane.b32.xlu1 %v1153_v54, %s1193_s14  ;;  %v708_v54 = vunpack.c.l.bf16 %v1109_v52 }
 0x1f9   : > { %v1155_v55 = vpop.eup %1154 }
 0x1fa   : > { %458 = vrot.lane.b32.xlu0 %v1155_v55, %s1193_s14 }
 0x268   : > { %v442_v56 = vpop.permute.xlu1 %441 }
 0x269   : > { %v444_v57 = vmul.f32 %v442_v56, %v408_v40 }
 0x26b   : > { %v469_v58 = vrot.slane %v444_v57, %v1295_v13 }
 0x26c   : > { %v459_v59 = vpop.permute.xlu0 %458 }
 0x26d   : > { %v461_v60 = vmul.f32 %v459_v59, %v416_v42  ;;  %470 = vrot.lane.b32.xlu1 %v469_v58, %s1191_s10 }
 0x26f   : > { %v1365_v62 = vrot.slane %v461_v60, %v1295_v13 }
 0x271   : > { %501 = vrot.lane.b32.xlu1 %v500_v61, %s1194_s16  ;;  %488 = vrot.lane.b32.xlu0 %v1365_v62, %s1193_s14 }
 0x2df   : > { %v471_v63 = vpop.permute.xlu1 %470 }
 0x2e0   : > { %474 = vst.msk [vmem:[%s1256_s11] sm:$0x3] %vm473_vm5, %v471_v63 }
 0x2e3   : > { %v489_v0 = vpop.permute.xlu0 %488 }
 0x2e4   : > { %v492_v1 = vsel %vm491_vm6, %v471_v63, %v489_v0 }
 0x2e5   : > { %v505_v2 = vpack.c.bf16 %v492_v1, %v492_v1 }
 0x2e7   : > { %1102 = vmatmul.mubr.msk.bf16.vlgmr.msra.gmra.mxu1 %vm357_vm1, %v505_v2 }
 0x2e8   : > { %814 = vmatpush1.bf16.msra.mxu1 %v1270_v3  ;;  %837 = vmatprep.mubr.bf16.mxu1 %v1189_v4 }
 0x2e9   : > { %815 = vmatprep.subr.bf16.mxu1 %v1277_v5 }
 0x2ec   : > { %816 = vmatpush1.bf16.msra.mxu1 %v1283_v9 }
 0x2ed   : > { %817 = vmatprep.subr.bf16.mxu1 %v1290_v10 }
 0x2f0   : > { %818 = vmatpush1.bf16.msra.mxu1 %v1301_v14 }
 0x2f1   : > { %819 = vmatprep.subr.bf16.mxu1 %v1308_v15  ;;  %v502_v15 = vpop.permute.xlu1 %501 }
 0x2f2   : > { %v504_v22 = vsel %vm491_vm6, %v502_v15, %v455_v53  ;;  %v700_v53 = vunpack.c.l.bf16 %v1108_v51 }
 0x2f3   : > { %v573_v24 = vrot.slane %v504_v22, %v1295_v13 }
 0x2f4   : > { %820 = vmatpush1.bf16.msra.mxu1 %v1318_v17 }
 0x3a7   : > { %v543_v12 = vpop.f32.mrf.mxu1 }
 0x3a8   : > { %v553_v3 = vadd.f32 %v552_v8, %v543_v12 }
 0x3a9   : > { %v545_v16 = vpop.f32.mrf.mxu1 }
 0x3aa   : > { %v554_v4 = vmul.f32 %v553_v3, %v1342_v27  ;;  %v561_v5 = vadd.f32 %v560_v11, %v545_v16 }
 0x3ab   : > { %v547_v18 = vpop.f32.mrf.mxu1 }
 0x3ac   : > { %1156 = vtanh.f32 %v554_v4  ;;  %v562_v9 = vmul.f32 %v561_v5, %v1342_v27 }
 0x3ad   : > { %v548_v10 = vpop.f32.mrf.mxu1 }
 0x3ae   : > { %1158 = vtanh.f32 %v562_v9 }
 0x3b9   : > { %v1157_v14 = vpop.eup %1156 }
 0x3ba   : > { %v556_v17 = vmul.f32 %v1157_v14, %v1342_v27 }
 0x3bb   : > { %v1159_v19 = vpop.eup %1158 }
 0x3bc   : > { %v557_v20 = vadd.f32 %v556_v17, %v1348_v37  ;;  %v564_v21 = vmul.f32 %v1159_v19, %v1342_v27 }
 0x3be   : > { %579 = vrot.lane.b32.xlu0 %v557_v20, %s1193_s14  ;;  %v565_v23 = vadd.f32 %v564_v21, %v1348_v37 }
 0x3c0   : > { %596 = vrot.lane.b32.xlu1 %v565_v23, %s1193_s14  ;;  %v594_v34 = vmul.f32 %v565_v23, %v504_v22 }
 0x3c2   : > { %574 = vrot.lane.b32.xlu0 %v573_v24, %s1191_s10 }
 0x430   : > { %v580_v25 = vpop.permute.xlu0 %579 }
 0x431   : > { %v582_v26 = vmul.f32 %v580_v25, %v557_v20 }
 0x432   : > { %v597_v28 = vpop.permute.xlu1 %596 }
 0x433   : > { %v599_v29 = vmul.f32 %v597_v28, %v565_v23  ;;  %584 = vrot.lane.b32.xlu1 %v582_v26, %s1191_s10 }
 0x434   : > { %v575_v30 = vpop.permute.xlu0 %574 }
 0x435   : > { %601 = vrot.lane.b32.xlu0 %v599_v29, %s1191_s10  ;;  %v577_v31 = vmul.f32 %v575_v30, %v557_v20 }
 0x4a5   : > { %v585_v32 = vpop.permute.xlu1 %584 }
 0x4a6   : > { %v587_v33 = vadd.f32 %v585_v32, %v577_v31 }
 0x4a7   : > { %v602_v35 = vpop.permute.xlu0 %601 }
 0x4a8   : > { %1160 = vtanh.f32 %v587_v33  ;;  %v604_v36 = vadd.f32 %v602_v35, %v594_v34  ;;  %v648_v46 = vrot.slane %v587_v33, %v1295_v13  ;;  %v1113_v35 = vld [vmem:[%s1246_s28 + $0x3] sm:$0x1] }
 0x4aa   : > { %1162 = vtanh.f32 %v604_v36 }
 0x4b5   : > { %v1161_v38 = vpop.eup %1160 }
 0x4b6   : > { %590 = vrot.lane.b32.xlu1 %v1161_v38, %s1193_s14  ;;  %v848_v38 = vunpack.c.l.bf16 %v1113_v35 }
 0x4b7   : > { %v1163_v39 = vpop.eup %1162 }
 0x4b8   : > { %607 = vrot.lane.b32.xlu0 %v1163_v39, %s1193_s14 }
 0x528   : > { %v591_v40 = vpop.permute.xlu1 %590 }
 0x529   : > { %v593_v41 = vmul.f32 %v591_v40, %v557_v20 }
 0x52a   : > { %v608_v42 = vpop.permute.xlu0 %607 }
 0x52b   : > { %v618_v43 = vrot.slane %v593_v41, %v1295_v13  ;;  %v610_v44 = vmul.f32 %v608_v42, %v565_v23 }
 0x52d   : > { %v1401_v45 = vrot.slane %v610_v44, %v1295_v13  ;;  %619 = vrot.lane.b32.xlu1 %v618_v43, %s1191_s10 }
 0x52f   : > { %637 = vrot.lane.b32.xlu0 %v1401_v45, %s1193_s14 }
 0x531   : > { %649 = vrot.lane.b32.xlu1 %v648_v46, %s1194_s16 }
 0x59f   : > { %v620_v47 = vpop.permute.xlu1 %619 }
 0x5a0   : > { %1105 = vst.msk [vmem:[%s1256_s11 + $0x2] sm:$0x3] %vm473_vm5, %v620_v47 }
 0x5a1   : > { %v638_v48 = vpop.permute.xlu0 %637 }
 0x5a2   : > { %v640_v49 = vsel %vm491_vm6, %v620_v47, %v638_v48 }
 0x5a3   : > { %v653_v50 = vpack.c.bf16 %v640_v49, %v640_v49  ;;  %v650_v1 = vpop.permute.xlu1 %649 }
 0x5a4   : > { %v652_v11 = vsel %vm491_vm6, %v650_v1, %v604_v36  ;;  %v854_v36 = vld [vmem:[%s1251_s8] sm:$0x1] }
 0x5a5   : > { %1107 = vmatmul.mubr.msk.bf16.vlgmr.msra.gmra.mxu0 %vm357_vm1, %v653_v50  ;;  %v721_v3 = vrot.slane %v652_v11, %v1295_v13  ;;  %v855_v39 = vunpack.c.l.bf16 %v854_v36 }
 0x665   : > { %v691_v55 = vpop.f32.mrf.mxu0 }
 0x666   : > { %v701_v56 = vadd.f32 %v700_v53, %v691_v55 }
 0x667   : > { %v693_v57 = vpop.f32.mrf.mxu0 }
 0x668   : > { %v702_v58 = vmul.f32 %v701_v56, %v1342_v27  ;;  %v709_v59 = vadd.f32 %v708_v54, %v693_v57 }
 0x669   : > { %v695_v60 = vpop.f32.mrf.mxu0 }
 0x66a   : > { %1164 = vtanh.f32 %v702_v58  ;;  %v710_v61 = vmul.f32 %v709_v59, %v1342_v27 }
 0x66b   : > { %v696_v63 = vpop.f32.mrf.mxu0 }
 0x66c   : > { %1166 = vtanh.f32 %v710_v61 }
 0x677   : > { %v1165_v0 = vpop.eup %1164 }
 0x678   : > { %v704_v2 = vmul.f32 %v1165_v0, %v1342_v27 }
 0x679   : > { %v1167_v6 = vpop.eup %1166 }
 0x67a   : > { %v705_v7 = vadd.f32 %v704_v2, %v1348_v37  ;;  %v712_v8 = vmul.f32 %v1167_v6, %v1342_v27 }
 0x67c   : > { %727 = vrot.lane.b32.xlu0 %v705_v7, %s1193_s14  ;;  %v713_v12 = vadd.f32 %v712_v8, %v1348_v37 }
 0x67e   : > { %744 = vrot.lane.b32.xlu1 %v713_v12, %s1193_s14  ;;  %v742_v17 = vmul.f32 %v713_v12, %v652_v11 }
 0x680   : > { %722 = vrot.lane.b32.xlu0 %v721_v3, %s1191_s10 }
 0x6ee   : > { %v728_v16 = vpop.permute.xlu0 %727 }
 0x6ef   : > { %v730_v4 = vmul.f32 %v728_v16, %v705_v7 }
 0x6f0   : > { %v745_v5 = vpop.permute.xlu1 %744 }
 0x6f1   : > { %v747_v18 = vmul.f32 %v745_v5, %v713_v12  ;;  %732 = vrot.lane.b32.xlu1 %v730_v4, %s1191_s10 }
 0x6f2   : > { %v723_v9 = vpop.permute.xlu0 %722 }
 0x6f3   : > { %749 = vrot.lane.b32.xlu0 %v747_v18, %s1191_s10  ;;  %v725_v10 = vmul.f32 %v723_v9, %v705_v7 }
 0x763   : > { %v733_v14 = vpop.permute.xlu1 %732 }
 0x764   : > { %v735_v15 = vadd.f32 %v733_v14, %v725_v10 }
 0x765   : > { %v750_v19 = vpop.permute.xlu0 %749 }
 0x766   : > { %1168 = vtanh.f32 %v735_v15  ;;  %v752_v20 = vadd.f32 %v750_v19, %v742_v17  ;;  %v796_v30 = vrot.slane %v735_v15, %v1295_v13 }
 0x768   : > { %1170 = vtanh.f32 %v752_v20 }
 0x773   : > { %v1169_v21 = vpop.eup %1168 }
 0x774   : > { %738 = vrot.lane.b32.xlu1 %v1169_v21, %s1193_s14 }
 0x775   : > { %v1171_v22 = vpop.eup %1170 }
 0x776   : > { %755 = vrot.lane.b32.xlu0 %v1171_v22, %s1193_s14 }
 0x7e6   : > { %v739_v23 = vpop.permute.xlu1 %738 }
 0x7e7   : > { %v741_v24 = vmul.f32 %v739_v23, %v705_v7 }
 0x7e8   : > { %v756_v25 = vpop.permute.xlu0 %755 }
 0x7e9   : > { %v766_v26 = vrot.slane %v741_v24, %v1295_v13  ;;  %v758_v28 = vmul.f32 %v756_v25, %v713_v12 }
 0x7eb   : > { %v779_v29 = vrot.slane %v758_v28, %v1295_v13  ;;  %767 = vrot.lane.b32.xlu1 %v766_v26, %s1191_s10 }
 0x7ed   : > { %785 = vrot.lane.b32.xlu0 %v779_v29, %s1193_s14 }
 0x7ef   : > { %797 = vrot.lane.b32.xlu1 %v796_v30, %s1194_s16 }
 0x85d   : > { %v768_v31 = vpop.permute.xlu1 %767 }
 0x85e   : > { %1110 = vst.msk [vmem:[%s1256_s11 + $0x4] sm:$0x3] %vm473_vm5, %v768_v31 }
 0x85f   : > { %v786_v32 = vpop.permute.xlu0 %785 }
 0x860   : > { %v788_v33 = vsel %vm491_vm6, %v768_v31, %v786_v32 }
 0x861   : > { %v801_v34 = vpack.c.bf16 %v788_v33, %v788_v33  ;;  %v798_v50 = vpop.permute.xlu1 %797 }
 0x862   : > { %v800_v55 = vsel %vm491_vm6, %v798_v50, %v752_v20 }
 0x863   : > { %1112 = vmatmul.mubr.msk.bf16.vlgmr.msra.gmra.mxu1 %vm357_vm1, %v801_v34  ;;  %v868_v57 = vrot.slane %v800_v55, %v1295_v13 }
 0x923   : > { %v839_v40 = vpop.f32.mrf.mxu1 }
 0x924   : > { %v849_v41 = vadd.f32 %v848_v38, %v839_v40 }
 0x925   : > { %v841_v42 = vpop.f32.mrf.mxu1 }
 0x926   : > { %v850_v43 = vmul.f32 %v849_v41, %v1342_v27  ;;  %v856_v44 = vadd.f32 %v855_v39, %v841_v42 }
 0x927   : > { %v843_v46 = vpop.f32.mrf.mxu1 }
 0x928   : > { %1172 = vtanh.f32 %v850_v43  ;;  %v857_v47 = vmul.f32 %v856_v44, %v1342_v27 }
 0x929   : > { %v844_v48 = vpop.f32.mrf.mxu1 }
 0x92a   : > { %1174 = vtanh.f32 %v857_v47 }
 0x935   : > { %v1173_v49 = vpop.eup %1172 }
 0x936   : > { %v852_v51 = vmul.f32 %v1173_v49, %v1342_v27 }
 0x937   : > { %v1175_v52 = vpop.eup %1174 }
 0x938   : > { %v853_v53 = vadd.f32 %v852_v51, %v1348_v37  ;;  %v859_v54 = vmul.f32 %v1175_v52, %v1342_v27 }
 0x93a   : > { %874 = vrot.lane.b32.xlu0 %v853_v53, %s1193_s14  ;;  %v860_v56 = vadd.f32 %v859_v54, %v1348_v37 }
 0x93c   : > { %891 = vrot.lane.b32.xlu1 %v860_v56, %s1193_s14  ;;  %v889_v2 = vmul.f32 %v860_v56, %v800_v55 }
 0x93e   : > { %869 = vrot.lane.b32.xlu0 %v868_v57, %s1191_s10 }
 0x9ac   : > { %v875_v58 = vpop.permute.xlu0 %874 }
 0x9ad   : > { %v877_v59 = vmul.f32 %v875_v58, %v853_v53 }
 0x9ae   : > { %v892_v60 = vpop.permute.xlu1 %891 }
 0x9af   : > { %v894_v61 = vmul.f32 %v892_v60, %v860_v56  ;;  %879 = vrot.lane.b32.xlu1 %v877_v59, %s1191_s10 }
 0x9b0   : > { %v870_v27 = vpop.permute.xlu0 %869 }
 0x9b1   : > { %896 = vrot.lane.b32.xlu0 %v894_v61, %s1191_s10  ;;  %v872_v63 = vmul.f32 %v870_v27, %v853_v53 }
 0xa21   : > { %v880_v0 = vpop.permute.xlu1 %879 }
 0xa22   : > { %v882_v1 = vadd.f32 %v880_v0, %v872_v63 }
 0xa23   : > { %v897_v37 = vpop.permute.xlu0 %896 }
 0xa24   : > { %1176 = vtanh.f32 %v882_v1  ;;  %v899_v6 = vadd.f32 %v897_v37, %v889_v2 }
 0xa26   : > { %1178 = vtanh.f32 %v899_v6 }
 0xa31   : > { %v1177_v7 = vpop.eup %1176 }
 0xa32   : > { %885 = vrot.lane.b32.xlu1 %v1177_v7, %s1193_s14 }
 0xa33   : > { %v1179_v8 = vpop.eup %1178 }
 0xa34   : > { %902 = vrot.lane.b32.xlu0 %v1179_v8, %s1193_s14 }
 0xa36   : > { %483 = vrot.lane.b32.xlu1 %v1365_v62, %s1191_s10 }
 0xa38   : > { %632 = vrot.lane.b32.xlu0 %v1401_v45, %s1191_s10  ;;  %v942_v45 = vrot.slane %v882_v1, %v1295_v13 }
 0xa3a   : > { %780 = vrot.lane.b32.xlu1 %v779_v29, %s1191_s10 }
 0xaa4   : > { %v886_v11 = vpop.permute.xlu1 %885 }
 0xaa5   : > { %v888_v12 = vmul.f32 %v886_v11, %v853_v53 }
 0xaa6   : > { %v903_v3 = vpop.permute.xlu0 %902 }
 0xaa7   : > { %v913_v16 = vrot.slane %v888_v12, %v1295_v13  ;;  %v905_v4 = vmul.f32 %v903_v3, %v860_v56 }
 0xaa8   : > { %v484_v5 = vpop.permute.xlu1 %483 }
 0xaa9   : > { %v926_v18 = vrot.slane %v905_v4, %v1295_v13  ;;  %1101 = vst.msk [vmem:[%s1261_s15 + $0x6] sm:$0x3] %vm473_vm5, %v484_v5  ;;  %914 = vrot.lane.b32.xlu0 %v913_v16, %s1191_s10 }
 0xaaa   : > { %v633_v62 = vpop.permute.xlu0 %632 }
 0xaab   : > { %1106 = vst.msk [vmem:[%s1261_s15 + $0x4] sm:$0x3] %vm473_vm5, %v633_v62  ;;  %931 = vrot.lane.b32.xlu1 %v926_v18, %s1193_s14 }
 0xaac   : > { %v781_v9 = vpop.permute.xlu1 %780 }
 0xaad   : > { %1111 = vst.msk [vmem:[%s1261_s15 + $0x2] sm:$0x3] %vm473_vm5, %v781_v9  ;;  %943 = vrot.lane.b32.xlu0 %v942_v45, %s1194_s16 }
 0xaaf   : > { %927 = vrot.lane.b32.xlu1 %v926_v18, %s1191_s10 }
 0xb1b   : > { %v915_v10 = vpop.permute.xlu0 %914 }
 0xb1c   : > { %1114 = vst.msk [vmem:[%s1256_s11 + $0x6] sm:$0x3] %vm473_vm5, %v915_v10 }
 0xb1d   : > { %v932_v14 = vpop.permute.xlu1 %931 }
 0xb1e   : > { %v934_v15 = vsel %vm491_vm6, %v915_v10, %v932_v14  ;;  %953 = sbr.rel (%p1115_p6) target bundleno = 2971 (0xb9b), region = 40 }
 0xb1f   : > { %948 = vst.msk [vmem:[#allocation2] sm:$0x3] %vm947_vm7, %v934_v15  ;;  %v944_v13 = vpop.permute.xlu0 %943 }
 0xb20   : > { %v946_v17 = vsel %vm491_vm6, %v944_v13, %v899_v6 }
 0xb21   : > { %949 = vst.msk [vmem:[#allocation3] sm:$0x3] %vm947_vm7, %v946_v17  ;;  %v928_v19 = vpop.permute.xlu1 %927 }
 0xb22   : > { %930 = vst.msk [vmem:[%s1261_s15] sm:$0x3] %vm473_vm5, %v928_v19 }
 0xb23   : > { %954 = vst.msk [vmem:[%s1505_s5] sm:$0x3] %vm473_vm5, %v934_v15  ;;  %961 = vst.msk [vmem:[%s1506_s6] sm:$0x3] %vm473_vm5, %v946_v17  ;;  %956 = vrot.lane.b32.xlu0 %v934_v15, %s1195_s18 }
 0xb27   : > { %963 = vrot.lane.b32.xlu0 %v946_v17, %s1195_s18 }
 0xb95   : > { %v957_v20 = vpop.permute.xlu0 %956 }
 0xb96   : > { %1116 = vst.msk [vmem:[%s1505_s5 + $0x2] sm:$0x3] %vm473_vm5, %v957_v20 }
 0xb99   : > { %v964_v21 = vpop.permute.xlu0 %963 }
 0xb9a   : > { %1117 = vst.msk [vmem:[%s1506_s6 + $0x2] sm:$0x3] %vm473_vm5, %v964_v21 }
 0xb9b PF: > { %s17_s21 = sadd.s32 1, %s1186_s21  }
 0xb9c   : > { %p14_p7 = scmp.ge.s32.totalorder %s17_s21, 4  }
 0xb9e   :  { %16 = sbr.rel (!%p14_p7) target bundleno = 1 (0x1), region = 115 }

// kernel: my_model_forward.3
= control target key start
LH: loop header
LB: loop body
LE: loop exit
PB: predicated region body
PF: predicated region fallthrough
CT: control target
= control target key end

     0   :  { %s1897_s0 = inlined_call_operand.vmem [shape: bf16[8,2,128], index: 0, kind: input, shape index: {}]   ;;  %s1898_s1 = inlined_call_operand.vmem [shape: bf16[8,2,128], index: 1, kind: input, shape index: {}]   ;;  %s1899_s2 = inlined_call_operand.vmem [shape: bf16[64,256], index: 2, kind: input, shape index: {}]   ;;  %s1900_s3 = inlined_call_operand.hbm [shape: f32[8,2,32], index: 3, kind: output, shape index: {0}]   ;;  %s1901_s4 = inlined_call_operand.hbm [shape: f32[8,2,32], index: 4, kind: output, shape index: {1}]   ;;  %s1902_s5 = inlined_call_operand.vmem [shape: f32[2,2,32], index: 5, kind: output, shape index: {2}]   ;;  %s1903_s6 = inlined_call_operand.vmem [shape: f32[2,2,32], index: 6, kind: output, shape index: {3}]  }
   0x1   :  { %1911 = sst [smem:[#allocation14_spill]] %s1897_s0 }
   0x2   :  { %12 = vsyncpa [#allocation5], 0 }
   0x3   :  { %14 = vsyncpa [#allocation5 + $0x1], 0 }
   0x4   :  { %15 = vsyncpa [#allocation7], 0 }
   0x5   :  { %17 = vsyncpa [#allocation7 + $0x1], 0  ;;  %s1439_s21 = smov 0   ;;  %s1441_s22 = smov 0  }
   0x6   :  { %s1443_s23 = smov 0   ;;  %s1445_s24 = smov 0  }
   0x7   :  { %s1447_s25 = smov 0   ;;  %s1449_s26 = smov 0  }
   0x8   :  { %s1451_s27 = smov 0  }
   0x9 LB: > { %1912 = sst [smem:[#allocation10_spill]] %s1375_s23  ;;  %s1475_s28 = sadd.s32 4294967295, %s1391_s27   ;;  %s1391_s27 = sphi %s1451_s27, %s1936_s27   ;;  %s1387_s26 = sphi %s1449_s26, %s1931_s26   ;;  %s1383_s25 = sphi %s1447_s25, %s1935_s25   ;;  %s1379_s24 = sphi %s1445_s24, %s1934_s24   ;;  %s1375_s23 = sphi %s1443_s23, %s1929_s23   ;;  %s1371_s22 = sphi %s1441_s22, %s1933_s22   ;;  %s1367_s21 = sphi %s1439_s21, %s1932_s21  }
   0xa   : > { %1913 = sst [smem:[#allocation11_spill]] %s1387_s26  ;;  %s1110_s29 = sadd.s32 4294967294, %s1391_s27  }
   0xb   : > { %s1479_s30 = sadd.s32 1, %s1391_s27   ;;  %s105_s7 = sadd.s32 1, %s1387_s26 }
   0xc   : > { %s102_s8 = ssub.s32 %s1391_s27, %s1479_s30  ;;  %p115_p0 = scmp.ne.s32.totalorder %s1387_s26, %s1383_s25 }
   0xd   : > { %p103_p1 = scmp.eq.s32.totalorder %s102_s8, 0  ;;  %p116_p2 = scmp.eq.s32.totalorder %s1475_s28, 1 }
   0xe   : > { %p121_p3 = scmp.ne.s32.totalorder %s1383_s25, %s1379_s24  ;;  %p1489_p4 = scmp.eq.s32.totalorder %s1110_s29, 1 }
   0xf   : > { %s1494_s10 = scalar_select %p103_p1, %s1387_s26, %s105_s7  }
  0x10   : > { %p1498_p5 = por %p116_p2, %p115_p0  ;;  %p1504_p6 = por %p1489_p4, %p121_p3 }
  0x11   : > { %1915 = sst [smem:[#allocation12_spill]] %s1494_s10  ;;  %s128_s13 = ssub.s32 1, %s1391_s27 }
  0x12   : > { %s129_s14 = ssub.s32 1, %s1479_s30  ;;  %s133_s16 = sadd.s32 1, %s1375_s23 }
  0x13   : > { %s130_s15 = ssub.s32 %s128_s13, %s129_s14  ;;  %p143_p8 = scmp.ne.s32.totalorder %s1375_s23, %s1371_s22 }
  0x14   : > { %p131_p7 = scmp.eq.s32.totalorder %s130_s15, 0  ;;  %p149_p9 = scmp.ne.s32.totalorder %s1371_s22, %s1367_s21 }
  0x15   : > { %p1113_p10 = scmp.ge.s32.totalorder %s1391_s27, 1  ;;  %p1521_p11 = por %p143_p8, %p116_p2 }
  0x16   : > { %s1517_s17 = scalar_select %p131_p7, %s1375_s23, %s133_s16  }
  0x17   : > { %p1527_p12 = por %p149_p9, %p1489_p4  ;;  %p231_p13 = scmp.lt.s32.totalorder %s1391_s27, 3 }
  0x18   : > { %1918 = sst [smem:[#allocation13_spill]] %s1517_s17 }
  0x19   : > { %p232_p0 = pnand %p1113_p10, %p231_p13 }
  0x1a   : > { %s1906_s20 = sand.u32 (!%p232_p0), 1, %s1383_s25   ;;  %s1907_s29 = sand.u32 (!%p232_p0), 1, %s1371_s22  }
  0x1b   : > { %235 = sbr.rel (%p232_p0) target bundleno = 3041 (0xbe1), region = 32  ;;  %s1114_s7 = sshll.u32 (!%p232_p0), %s1906_s20, 3 }
  0x1c   : > { %s1115_s8 = sshll.u32 (!%p232_p0), %s1907_s29, 3  ;;  %s1116_s9 = sshll.u32 (!%p232_p0), %s1475_s28, 2 }
  0x1d   : > { %s1908_s13 = ssub.s32 (!%p232_p0), 1, %s1475_s28  ;;  %p271_p1 = scmp.lt.s32.totalorder (!%p232_p0), %s1116_s9, 7 }
  0x1e   : > { %s1117_s14 = sshll.u32 (!%p232_p0), %s1908_s13, 2  ;;  %s1921_s0 = sld [smem:[#allocation14_spill]] (!%p232_p0) }
  0x1f   : > { %p277_p2 = scmp.lt.s32.totalorder (!%p232_p0), %s1117_s14, 7  ;;  %s1552_s20 = scalar_lea.vmem (!%p232_p0), [#allocation4], %s1114_s7 }
  0x20   : > { %s1938_s9 = smov (!%p271_p1, %s1116_s9), 7  ;;  %s1554_s29 = scalar_lea.vmem [#allocation6], %s1115_s8 }
  0x21   : > { %s1940_s14 = smov (!%p277_p2, %s1117_s14), 7  ;;  %p1118_p3 = scmp.ne.s32.totalorder %s1475_s28, 0 }
  0x22   : > { %s1550_s23 = scalar_lea.vmem %s1898_s1, %s1940_s14 }
  0x23   : > { %289 = sbr.rel (%p1118_p3) target bundleno = 42 (0x2a), region = 36 }
  0x24   : > { %s1545_s10 = scalar_lea.vmem %s1921_s0, %s1938_s9 }
  0x28   : > { %vm290_vm0 = vcmask 517120   ;;  %v1393_v0 = vmov 0.0  }
  0x29   : > { %291 = vst.msk [vmem:[#allocation2] sm:$0x3] %vm290_vm0, %v1393_v0  ;;  %292 = vst.msk [vmem:[#allocation3] sm:$0x3] %vm290_vm0, %v1393_v0 }
  0x2a PF: > { %v1233_v1 = vld [vmem:[%s1899_s2 + $0x34] ss:$8 sps:$4 sm:$0xff]   ;;  %v301_v2 = vlaneseq  ;;  %v1563_v3 = vld [vmem:[%s1899_s2 + $0x30] ss:$8 sps:$4 sm:$0xff]   ;;  %v1394_v4 = vmov 0   ;;  %s1909_s14 = smov 32  }
  0x2b   : > { %387 = vmatprep.mubr.bf16.mxu0 %v1394_v4  ;;  %535 = vmatprep.mubr.bf16.mxu1 %v1394_v4  ;;  %v1570_v5 = vld [vmem:[%s1899_s2 + $0x24] ss:$8 sps:$4 sm:$0xff]   ;;  %v1395_v6 = vmov 1983009808   ;;  %v1576_v9 = vld [vmem:[%s1899_s2 + $0x20] ss:$8 sps:$4 sm:$0xff]  }
  0x2c   : > { %363 = vmatprep.subr.bf16.mxu0 %v1233_v1  ;;  %v413_v7 = vunpack.c.l.s4 %v1395_v6  ;;  %v416_v8 = vshrl.u32 %v301_v2, 7  ;;  %511 = vmatprep.subr.bf16.mxu1 %v1233_v1  ;;  %v1583_v10 = vld [vmem:[%s1899_s2 + $0x14] ss:$8 sps:$4 sm:$0xff]   ;;  %v1594_v14 = vld [vmem:[%s1899_s2 + $0x10] ss:$8 sps:$4 sm:$0xff]   ;;  %vm351_vm1 = vcmask 523264  }
  0x2d   : > { %364 = vmatpush1.bf16.msra.mxu0 %v1563_v3  ;;  %512 = vmatpush1.bf16.msra.mxu1 %v1563_v3  ;;  %v1601_v15 = vld [vmem:[%s1899_s2 + $0x4] ss:$8 sps:$4 sm:$0xff]   ;;  %v1611_v17 = vld [vmem:[%s1899_s2] ss:$8 sps:$4 sm:$0xff]   ;;  %v302_v20 = vand.u32 127, %v301_v2  ;;  %v1397_v26 = vmov 0.5  }
  0x2e   : > { %365 = vmatprep.subr.bf16.mxu0 %v1570_v5  ;;  %v414_v11 = vunpack.c.0.s8 %v413_v7  ;;  %513 = vmatprep.subr.bf16.mxu1 %v1570_v5  ;;  %v396_v21 = vld [vmem:[%s1545_s10] sm:$0x1]  ;;  %v1128_v22 = vld [vmem:[%s1550_s23 + $0x3] sm:$0x1]  ;;  %s1398_s9 = smov 64   ;;  %s1399_s26 = smov 96  }
  0x2f   : > { %vm303_vm2 = vcmp.ge.s32.totalorder %v302_v20, 64  ;;  %vm304_vm3 = vcmp.lt.s32.totalorder %v302_v20, 96  ;;  %v397_v24 = vunpack.c.l.bf16 %v396_v21  ;;  %v405_v25 = vunpack.c.l.bf16 %v1128_v22  ;;  %v1131_v6 = vld [vmem:[%s1545_s10 + $0x1] sm:$0x1]  ;;  %v1132_v7 = vld [vmem:[%s1550_s23 + $0x2] sm:$0x1] }
  0x30   : > { %v1586_v12 = vld [vmem:[#allocation3] sm:$0x3]  ;;  %v1588_v13 = vsub.s32 %v414_v11, %v416_v8  ;;  %v308_v18 = vld [vmem:[#allocation2] sm:$0x3]  ;;  %vm1629_vm4 = vmand %vm303_vm2, %vm304_vm3  ;;  %vm467_vm5 = vcmask 254976   ;;  %vm485_vm6 = vcmask 261120   ;;  %v546_v8 = vunpack.c.l.bf16 %v1131_v6 }
  0x31   : > { %366 = vmatpush1.bf16.msra.mxu0 %v1576_v9  ;;  %514 = vmatpush1.bf16.msra.mxu1 %v1576_v9  ;;  %v310_v19 = vpack.c.bf16 %v308_v18, %v308_v18  ;;  %v1635_v27 = vsel %vm1629_vm4, 1.0, %v1397_v26  ;;  %v1641_v37 = vsel %vm1629_vm4, 0.0, %v1397_v26  ;;  %v554_v11 = vunpack.c.l.bf16 %v1132_v7  ;;  %p1143_p4 = scmp.ne.s32.totalorder %s1475_s28, 1 }
  0x32   : > { %367 = vmatprep.subr.bf16.mxu0 %v1583_v10  ;;  %v418_v16 = vrot.slane %v1586_v12, %v1588_v13  ;;  %515 = vmatprep.subr.bf16.mxu1 %v1583_v10  ;;  %vm941_vm7 = vcmask 517120   ;;  %s1400_s8 = smov (!%p1143_p4), 96  }
  0x34   : > { %419 = vrot.lane.b32.xlu1 %v418_v16, %s1909_s14 }
  0x35   : > { %368 = vmatpush1.bf16.msra.mxu0 %v1594_v14  ;;  %516 = vmatpush1.bf16.msra.mxu1 %v1594_v14 }
  0x36   : > { %369 = vmatprep.subr.bf16.mxu0 %v1601_v15  ;;  %517 = vmatprep.subr.bf16.mxu1 %v1601_v15 }
  0x39   : > { %370 = vmatpush1.bf16.msra.mxu0 %v1611_v17  ;;  %518 = vmatpush1.bf16.msra.mxu1 %v1611_v17 }
  0x3a   : > { %659 = vmatprep.subr.bf16.mxu0 %v1233_v1  ;;  %807 = vmatprep.subr.bf16.mxu1 %v1233_v1 }
  0x3c   : > { %1127 = vmatmul.mubr.msk.bf16.vlgmr.msra.gmra.mxu0 %vm351_vm1, %v310_v19 }
  0x3d   : > { %660 = vmatpush1.bf16.msra.mxu0 %v1563_v3  ;;  %683 = vmatprep.mubr.bf16.mxu0 %v1394_v4 }
  0x3e   : > { %661 = vmatprep.subr.bf16.mxu0 %v1570_v5 }
  0x41   : > { %662 = vmatpush1.bf16.msra.mxu0 %v1576_v9 }
  0x42   : > { %663 = vmatprep.subr.bf16.mxu0 %v1583_v10 }
  0x45   : > { %664 = vmatpush1.bf16.msra.mxu0 %v1594_v14 }
  0x46   : > { %665 = vmatprep.subr.bf16.mxu0 %v1601_v15 }
  0x49   : > { %666 = vmatpush1.bf16.msra.mxu0 %v1611_v17 }
  0xa6   : > { %v420_v47 = vpop.permute.xlu1 %419 }
  0xfc   : > { %v389_v28 = vpop.f32.mrf.mxu0 }
  0xfd   : > { %v398_v29 = vadd.f32 %v397_v24, %v389_v28 }
  0xfe   : > { %v391_v30 = vpop.f32.mrf.mxu0 }
  0xff   : > { %v399_v31 = vmul.f32 %v398_v29, %v1635_v27  ;;  %v406_v32 = vadd.f32 %v405_v25, %v391_v30 }
 0x100   : > { %v393_v33 = vpop.f32.mrf.mxu0 }
 0x101   : > { %1245 = vtanh.f32 %v399_v31  ;;  %v407_v34 = vmul.f32 %v406_v32, %v1635_v27 }
 0x102   : > { %v394_v35 = vpop.f32.mrf.mxu0 }
 0x103   : > { %1247 = vtanh.f32 %v407_v34 }
 0x10e   : > { %v1246_v36 = vpop.eup %1245 }
 0x10f   : > { %v401_v38 = vmul.f32 %v1246_v36, %v1635_v27 }
 0x110   : > { %v1248_v39 = vpop.eup %1247 }
 0x111   : > { %v402_v40 = vadd.f32 %v401_v38, %v1641_v37  ;;  %v409_v41 = vmul.f32 %v1248_v39, %v1635_v27 }
 0x113   : > { %424 = vrot.lane.b32.xlu0 %v402_v40, %s1398_s9  ;;  %v410_v42 = vadd.f32 %v409_v41, %v1641_v37  ;;  %v422_v48 = vmul.f32 %v420_v47, %v402_v40 }
 0x115   : > { %v439_v51 = vmul.f32 %v410_v42, %v1586_v12 }
 0x117   : > { %441 = vrot.lane.b32.xlu0 %v410_v42, %s1398_s9 }
 0x185   : > { %v425_v43 = vpop.permute.xlu0 %424 }
 0x186   : > { %v427_v44 = vmul.f32 %v425_v43, %v402_v40 }
 0x188   : > { %429 = vrot.lane.b32.xlu1 %v427_v44, %s1909_s14 }
 0x189   : > { %v442_v45 = vpop.permute.xlu0 %441 }
 0x18a   : > { %v444_v46 = vmul.f32 %v442_v45, %v410_v42 }
 0x18c   : > { %446 = vrot.lane.b32.xlu0 %v444_v46, %s1909_s14 }
 0x1fa   : > { %v430_v49 = vpop.permute.xlu1 %429 }
 0x1fb   : > { %v432_v50 = vadd.f32 %v430_v49, %v422_v48 }
 0x1fd   : > { %1249 = vtanh.f32 %v432_v50  ;;  %v494_v61 = vrot.slane %v432_v50, %v1588_v13 }
 0x1fe   : > { %v447_v52 = vpop.permute.xlu0 %446 }
 0x1ff   : > { %v449_v53 = vadd.f32 %v447_v52, %v439_v51  ;;  %v1136_v51 = vld [vmem:[%s1545_s10 + $0x2] sm:$0x1]  ;;  %v1137_v52 = vld [vmem:[%s1550_s23 + $0x1] sm:$0x1] }
 0x201   : > { %1251 = vtanh.f32 %v449_v53 }
 0x20a   : > { %v1250_v54 = vpop.eup %1249 }
 0x20b   : > { %435 = vrot.lane.b32.xlu1 %v1250_v54, %s1398_s9  ;;  %v702_v54 = vunpack.c.l.bf16 %v1137_v52 }
 0x20e   : > { %v1252_v55 = vpop.eup %1251 }
 0x20f   : > { %452 = vrot.lane.b32.xlu0 %v1252_v55, %s1398_s9 }
 0x27d   : > { %v436_v56 = vpop.permute.xlu1 %435 }
 0x27e   : > { %v438_v57 = vmul.f32 %v436_v56, %v402_v40 }
 0x280   : > { %v463_v58 = vrot.slane %v438_v57, %v1588_v13 }
 0x281   : > { %v453_v59 = vpop.permute.xlu0 %452 }
 0x282   : > { %v455_v60 = vmul.f32 %v453_v59, %v410_v42  ;;  %464 = vrot.lane.b32.xlu1 %v463_v58, %s1909_s14 }
 0x284   : > { %v1658_v62 = vrot.slane %v455_v60, %v1588_v13 }
 0x286   : > { %495 = vrot.lane.b32.xlu1 %v494_v61, %s1399_s26  ;;  %482 = vrot.lane.b32.xlu0 %v1658_v62, %s1398_s9 }
 0x2f4   : > { %v465_v63 = vpop.permute.xlu1 %464 }
 0x2f5   : > { %468 = vst.msk [vmem:[%s1552_s20] sm:$0x3] %vm467_vm5, %v465_v63 }
 0x2f8   : > { %v483_v0 = vpop.permute.xlu0 %482 }
 0x2f9   : > { %v486_v1 = vsel %vm485_vm6, %v465_v63, %v483_v0 }
 0x2fa   : > { %v499_v2 = vpack.c.bf16 %v486_v1, %v486_v1 }
 0x2fc   : > { %1130 = vmatmul.mubr.msk.bf16.vlgmr.msra.gmra.mxu1 %vm351_vm1, %v499_v2 }
 0x2fd   : > { %808 = vmatpush1.bf16.msra.mxu1 %v1563_v3  ;;  %831 = vmatprep.mubr.bf16.mxu1 %v1394_v4 }
 0x2fe   : > { %809 = vmatprep.subr.bf16.mxu1 %v1570_v5 }
 0x301   : > { %810 = vmatpush1.bf16.msra.mxu1 %v1576_v9 }
 0x302   : > { %811 = vmatprep.subr.bf16.mxu1 %v1583_v10 }
 0x305   : > { %812 = vmatpush1.bf16.msra.mxu1 %v1594_v14 }
 0x306   : > { %813 = vmatprep.subr.bf16.mxu1 %v1601_v15  ;;  %v496_v15 = vpop.permute.xlu1 %495 }
 0x307   : > { %v498_v22 = vsel %vm485_vm6, %v496_v15, %v449_v53  ;;  %v694_v53 = vunpack.c.l.bf16 %v1136_v51 }
 0x308   : > { %v567_v24 = vrot.slane %v498_v22, %v1588_v13 }
 0x309   : > { %814 = vmatpush1.bf16.msra.mxu1 %v1611_v17 }
 0x3bc   : > { %v537_v12 = vpop.f32.mrf.mxu1 }
 0x3bd   : > { %v547_v3 = vadd.f32 %v546_v8, %v537_v12 }
 0x3be   : > { %v539_v16 = vpop.f32.mrf.mxu1 }
 0x3bf   : > { %v548_v4 = vmul.f32 %v547_v3, %v1635_v27  ;;  %v555_v5 = vadd.f32 %v554_v11, %v539_v16 }
 0x3c0   : > { %v541_v18 = vpop.f32.mrf.mxu1 }
 0x3c1   : > { %1253 = vtanh.f32 %v548_v4  ;;  %v556_v9 = vmul.f32 %v555_v5, %v1635_v27 }
 0x3c2   : > { %v542_v10 = vpop.f32.mrf.mxu1 }
 0x3c3   : > { %1255 = vtanh.f32 %v556_v9 }
 0x3ce   : > { %v1254_v14 = vpop.eup %1253 }
 0x3cf   : > { %v550_v17 = vmul.f32 %v1254_v14, %v1635_v27 }
 0x3d0   : > { %v1256_v19 = vpop.eup %1255 }
 0x3d1   : > { %v551_v20 = vadd.f32 %v550_v17, %v1641_v37  ;;  %v558_v21 = vmul.f32 %v1256_v19, %v1635_v27 }
 0x3d3   : > { %573 = vrot.lane.b32.xlu0 %v551_v20, %s1398_s9  ;;  %v559_v23 = vadd.f32 %v558_v21, %v1641_v37 }
 0x3d5   : > { %590 = vrot.lane.b32.xlu1 %v559_v23, %s1398_s9  ;;  %v588_v34 = vmul.f32 %v559_v23, %v498_v22 }
 0x3d7   : > { %568 = vrot.lane.b32.xlu0 %v567_v24, %s1909_s14 }
 0x445   : > { %v574_v25 = vpop.permute.xlu0 %573 }
 0x446   : > { %v576_v26 = vmul.f32 %v574_v25, %v551_v20 }
 0x447   : > { %v591_v28 = vpop.permute.xlu1 %590 }
 0x448   : > { %v593_v29 = vmul.f32 %v591_v28, %v559_v23  ;;  %578 = vrot.lane.b32.xlu1 %v576_v26, %s1909_s14 }
 0x449   : > { %v569_v30 = vpop.permute.xlu0 %568 }
 0x44a   : > { %595 = vrot.lane.b32.xlu0 %v593_v29, %s1909_s14  ;;  %v571_v31 = vmul.f32 %v569_v30, %v551_v20 }
 0x4ba   : > { %v579_v32 = vpop.permute.xlu1 %578 }
 0x4bb   : > { %v581_v33 = vadd.f32 %v579_v32, %v571_v31 }
 0x4bc   : > { %v596_v35 = vpop.permute.xlu0 %595 }
 0x4bd   : > { %1257 = vtanh.f32 %v581_v33  ;;  %v598_v36 = vadd.f32 %v596_v35, %v588_v34  ;;  %v642_v46 = vrot.slane %v581_v33, %v1588_v13  ;;  %v1141_v35 = vld [vmem:[%s1545_s10 + $0x3] sm:$0x1] }
 0x4bf   : > { %1259 = vtanh.f32 %v598_v36 }
 0x4ca   : > { %v1258_v38 = vpop.eup %1257 }
 0x4cb   : > { %584 = vrot.lane.b32.xlu1 %v1258_v38, %s1398_s9  ;;  %v842_v38 = vunpack.c.l.bf16 %v1141_v35 }
 0x4cc   : > { %v1260_v39 = vpop.eup %1259 }
 0x4cd   : > { %601 = vrot.lane.b32.xlu0 %v1260_v39, %s1398_s9 }
 0x53d   : > { %v585_v40 = vpop.permute.xlu1 %584 }
 0x53e   : > { %v587_v41 = vmul.f32 %v585_v40, %v551_v20 }
 0x53f   : > { %v602_v42 = vpop.permute.xlu0 %601 }
 0x540   : > { %v612_v43 = vrot.slane %v587_v41, %v1588_v13  ;;  %v604_v44 = vmul.f32 %v602_v42, %v559_v23 }
 0x542   : > { %v1694_v45 = vrot.slane %v604_v44, %v1588_v13  ;;  %613 = vrot.lane.b32.xlu1 %v612_v43, %s1909_s14 }
 0x544   : > { %631 = vrot.lane.b32.xlu0 %v1694_v45, %s1398_s9 }
 0x546   : > { %643 = vrot.lane.b32.xlu1 %v642_v46, %s1399_s26 }
 0x5b4   : > { %v614_v47 = vpop.permute.xlu1 %613 }
 0x5b5   : > { %1133 = vst.msk [vmem:[%s1552_s20 + $0x2] sm:$0x3] %vm467_vm5, %v614_v47 }
 0x5b6   : > { %v632_v48 = vpop.permute.xlu0 %631 }
 0x5b7   : > { %v634_v49 = vsel %vm485_vm6, %v614_v47, %v632_v48 }
 0x5b8   : > { %v647_v50 = vpack.c.bf16 %v634_v49, %v634_v49  ;;  %v644_v1 = vpop.permute.xlu1 %643 }
 0x5b9   : > { %v646_v11 = vsel %vm485_vm6, %v644_v1, %v598_v36  ;;  %v848_v36 = vld [vmem:[%s1550_s23] sm:$0x1] }
 0x5ba   : > { %1135 = vmatmul.mubr.msk.bf16.vlgmr.msra.gmra.mxu0 %vm351_vm1, %v647_v50  ;;  %v715_v3 = vrot.slane %v646_v11, %v1588_v13  ;;  %v849_v39 = vunpack.c.l.bf16 %v848_v36 }
 0x67a   : > { %v685_v55 = vpop.f32.mrf.mxu0 }
 0x67b   : > { %v695_v56 = vadd.f32 %v694_v53, %v685_v55 }
 0x67c   : > { %v687_v57 = vpop.f32.mrf.mxu0 }
 0x67d   : > { %v696_v58 = vmul.f32 %v695_v56, %v1635_v27  ;;  %v703_v59 = vadd.f32 %v702_v54, %v687_v57 }
 0x67e   : > { %v689_v60 = vpop.f32.mrf.mxu0 }
 0x67f   : > { %1261 = vtanh.f32 %v696_v58  ;;  %v704_v61 = vmul.f32 %v703_v59, %v1635_v27 }
 0x680   : > { %v690_v63 = vpop.f32.mrf.mxu0 }
 0x681   : > { %1263 = vtanh.f32 %v704_v61 }
 0x68c   : > { %v1262_v0 = vpop.eup %1261 }
 0x68d   : > { %v698_v2 = vmul.f32 %v1262_v0, %v1635_v27 }
 0x68e   : > { %v1264_v6 = vpop.eup %1263 }
 0x68f   : > { %v699_v7 = vadd.f32 %v698_v2, %v1641_v37  ;;  %v706_v8 = vmul.f32 %v1264_v6, %v1635_v27 }
 0x691   : > { %721 = vrot.lane.b32.xlu0 %v699_v7, %s1398_s9  ;;  %v707_v12 = vadd.f32 %v706_v8, %v1641_v37 }
 0x693   : > { %738 = vrot.lane.b32.xlu1 %v707_v12, %s1398_s9  ;;  %v736_v17 = vmul.f32 %v707_v12, %v646_v11 }
 0x695   : > { %716 = vrot.lane.b32.xlu0 %v715_v3, %s1909_s14 }
 0x703   : > { %v722_v16 = vpop.permute.xlu0 %721 }
 0x704   : > { %v724_v4 = vmul.f32 %v722_v16, %v699_v7 }
 0x705   : > { %v739_v5 = vpop.permute.xlu1 %738 }
 0x706   : > { %v741_v18 = vmul.f32 %v739_v5, %v707_v12  ;;  %726 = vrot.lane.b32.xlu1 %v724_v4, %s1909_s14 }
 0x707   : > { %v717_v9 = vpop.permute.xlu0 %716 }
 0x708   : > { %743 = vrot.lane.b32.xlu0 %v741_v18, %s1909_s14  ;;  %v719_v10 = vmul.f32 %v717_v9, %v699_v7 }
 0x778   : > { %v727_v14 = vpop.permute.xlu1 %726 }
 0x779   : > { %v729_v15 = vadd.f32 %v727_v14, %v719_v10 }
 0x77a   : > { %v744_v19 = vpop.permute.xlu0 %743 }
 0x77b   : > { %1265 = vtanh.f32 %v729_v15  ;;  %v746_v20 = vadd.f32 %v744_v19, %v736_v17  ;;  %v790_v30 = vrot.slane %v729_v15, %v1588_v13 }
 0x77d   : > { %1267 = vtanh.f32 %v746_v20 }
 0x788   : > { %v1266_v21 = vpop.eup %1265 }
 0x789   : > { %732 = vrot.lane.b32.xlu1 %v1266_v21, %s1398_s9 }
 0x78a   : > { %v1268_v22 = vpop.eup %1267 }
 0x78b   : > { %749 = vrot.lane.b32.xlu0 %v1268_v22, %s1398_s9 }
 0x7fb   : > { %v733_v23 = vpop.permute.xlu1 %732 }
 0x7fc   : > { %v735_v24 = vmul.f32 %v733_v23, %v699_v7 }
 0x7fd   : > { %v750_v25 = vpop.permute.xlu0 %749 }
 0x7fe   : > { %v760_v26 = vrot.slane %v735_v24, %v1588_v13  ;;  %v752_v28 = vmul.f32 %v750_v25, %v707_v12 }
 0x800   : > { %v1724_v29 = vrot.slane %v752_v28, %v1588_v13  ;;  %761 = vrot.lane.b32.xlu1 %v760_v26, %s1909_s14 }
 0x802   : > { %779 = vrot.lane.b32.xlu0 %v1724_v29, %s1398_s9 }
 0x804   : > { %791 = vrot.lane.b32.xlu1 %v790_v30, %s1399_s26 }
 0x872   : > { %v762_v31 = vpop.permute.xlu1 %761 }
 0x873   : > { %1138 = vst.msk [vmem:[%s1552_s20 + $0x4] sm:$0x3] %vm467_vm5, %v762_v31 }
 0x874   : > { %v780_v32 = vpop.permute.xlu0 %779 }
 0x875   : > { %v782_v33 = vsel %vm485_vm6, %v762_v31, %v780_v32 }
 0x876   : > { %v795_v34 = vpack.c.bf16 %v782_v33, %v782_v33  ;;  %v792_v50 = vpop.permute.xlu1 %791 }
 0x877   : > { %v794_v55 = vsel %vm485_vm6, %v792_v50, %v746_v20 }
 0x878   : > { %1140 = vmatmul.mubr.msk.bf16.vlgmr.msra.gmra.mxu1 %vm351_vm1, %v795_v34  ;;  %v862_v57 = vrot.slane %v794_v55, %v1588_v13 }
 0x938   : > { %v833_v40 = vpop.f32.mrf.mxu1 }
 0x939   : > { %v843_v41 = vadd.f32 %v842_v38, %v833_v40 }
 0x93a   : > { %v835_v42 = vpop.f32.mrf.mxu1 }
 0x93b   : > { %v844_v43 = vmul.f32 %v843_v41, %v1635_v27  ;;  %v850_v44 = vadd.f32 %v849_v39, %v835_v42 }
 0x93c   : > { %v837_v46 = vpop.f32.mrf.mxu1 }
 0x93d   : > { %1269 = vtanh.f32 %v844_v43  ;;  %v851_v47 = vmul.f32 %v850_v44, %v1635_v27 }
 0x93e   : > { %v838_v48 = vpop.f32.mrf.mxu1 }
 0x93f   : > { %1271 = vtanh.f32 %v851_v47 }
 0x94a   : > { %v1270_v49 = vpop.eup %1269 }
 0x94b   : > { %v846_v51 = vmul.f32 %v1270_v49, %v1635_v27 }
 0x94c   : > { %v1272_v52 = vpop.eup %1271 }
 0x94d   : > { %v847_v53 = vadd.f32 %v846_v51, %v1641_v37  ;;  %v853_v54 = vmul.f32 %v1272_v52, %v1635_v27 }
 0x94f   : > { %868 = vrot.lane.b32.xlu0 %v847_v53, %s1398_s9  ;;  %v854_v56 = vadd.f32 %v853_v54, %v1641_v37 }
 0x951   : > { %885 = vrot.lane.b32.xlu1 %v854_v56, %s1398_s9  ;;  %v883_v2 = vmul.f32 %v854_v56, %v794_v55 }
 0x953   : > { %863 = vrot.lane.b32.xlu0 %v862_v57, %s1909_s14 }
 0x9c1   : > { %v869_v58 = vpop.permute.xlu0 %868 }
 0x9c2   : > { %v871_v59 = vmul.f32 %v869_v58, %v847_v53 }
 0x9c3   : > { %v886_v60 = vpop.permute.xlu1 %885 }
 0x9c4   : > { %v888_v61 = vmul.f32 %v886_v60, %v854_v56  ;;  %873 = vrot.lane.b32.xlu1 %v871_v59, %s1909_s14 }
 0x9c5   : > { %v864_v27 = vpop.permute.xlu0 %863 }
 0x9c6   : > { %890 = vrot.lane.b32.xlu0 %v888_v61, %s1909_s14  ;;  %v866_v63 = vmul.f32 %v864_v27, %v847_v53 }
 0xa36   : > { %v874_v0 = vpop.permute.xlu1 %873 }
 0xa37   : > { %v876_v1 = vadd.f32 %v874_v0, %v866_v63 }
 0xa38   : > { %v891_v37 = vpop.permute.xlu0 %890 }
 0xa39   : > { %1273 = vtanh.f32 %v876_v1  ;;  %v893_v6 = vadd.f32 %v891_v37, %v883_v2  ;;  %v936_v11 = vrot.slane %v876_v1, %v1588_v13 }
 0xa3b   : > { %1275 = vtanh.f32 %v893_v6 }
 0xa46   : > { %v1274_v7 = vpop.eup %1273 }
 0xa47   : > { %879 = vrot.lane.b32.xlu1 %v1274_v7, %s1398_s9 }
 0xa48   : > { %v1276_v8 = vpop.eup %1275 }
 0xa49   : > { %896 = vrot.lane.b32.xlu0 %v1276_v8, %s1398_s9 }
 0xa4b   : > { %937 = vrot.lane.b32.xlu1 %v936_v11, %s1399_s26 }
 0xa4d   : > { %477 = vrot.lane.b32.xlu0 %v1658_v62, %s1909_s14 }
 0xa4f   : > { %626 = vrot.lane.b32.xlu1 %v1694_v45, %s1909_s14 }
 0xab9   : > { %v880_v12 = vpop.permute.xlu1 %879 }
 0xaba   : > { %v882_v3 = vmul.f32 %v880_v12, %v847_v53 }
 0xabb   : > { %v897_v16 = vpop.permute.xlu0 %896 }
 0xabc   : > { %v907_v4 = vrot.slane %v882_v3, %v1588_v13  ;;  %v899_v5 = vmul.f32 %v897_v16, %v854_v56 }
 0xabd   : > { %v938_v18 = vpop.permute.xlu1 %937 }
 0xabe   : > { %v920_v9 = vrot.slane %v899_v5, %v1588_v13  ;;  %v940_v10 = vsel %vm485_vm6, %v938_v18, %v893_v6  ;;  %908 = vrot.lane.b32.xlu1 %v907_v4, %s1909_s14 }
 0xabf   : > { %943 = vst.msk [vmem:[#allocation3] sm:$0x3] %vm941_vm7, %v940_v10  ;;  %v478_v62 = vpop.permute.xlu0 %477 }
 0xac0   : > { %1129 = vst.msk [vmem:[%s1554_s29 + $0x6] sm:$0x3] %vm467_vm5, %v478_v62  ;;  %925 = vrot.lane.b32.xlu0 %v920_v9, %s1398_s9 }
 0xac1   : > { %v627_v45 = vpop.permute.xlu1 %626 }
 0xac2   : > { %1134 = vst.msk [vmem:[%s1554_s29 + $0x4] sm:$0x3] %vm467_vm5, %v627_v45  ;;  %921 = vrot.lane.b32.xlu1 %v920_v9, %s1909_s14 }
 0xac4   : > { %774 = vrot.lane.b32.xlu0 %v1724_v29, %s1909_s14 }
 0xb30   : > { %v909_v13 = vpop.permute.xlu1 %908 }
 0xb31   : > { %1142 = vst.msk [vmem:[%s1552_s20 + $0x6] sm:$0x3] %vm467_vm5, %v909_v13 }
 0xb32   : > { %v926_v14 = vpop.permute.xlu0 %925 }
 0xb33   : > { %v928_v15 = vsel %vm485_vm6, %v909_v13, %v926_v14  ;;  %947 = sbr.rel (%p1143_p4) target bundleno = 2992 (0xbb0), region = 40 }
 0xb34   : > { %942 = vst.msk [vmem:[#allocation2] sm:$0x3] %vm941_vm7, %v928_v15  ;;  %v922_v17 = vpop.permute.xlu1 %921 }
 0xb35   : > { %924 = vst.msk [vmem:[%s1554_s29] sm:$0x3] %vm467_vm5, %v922_v17 }
 0xb36   : > { %v775_v19 = vpop.permute.xlu0 %774 }
 0xb37   : > { %1139 = vst.msk [vmem:[%s1554_s29 + $0x2] sm:$0x3] %vm467_vm5, %v775_v19 }
 0xb38   : > { %948 = vst.msk [vmem:[%s1902_s5] sm:$0x3] %vm467_vm5, %v928_v15  ;;  %955 = vst.msk [vmem:[%s1903_s6] sm:$0x3] %vm467_vm5, %v940_v10  ;;  %950 = vrot.lane.b32.xlu0 %v928_v15, %s1400_s8 }
 0xb3c   : > { %957 = vrot.lane.b32.xlu0 %v940_v10, %s1400_s8 }
 0xbaa   : > { %v951_v20 = vpop.permute.xlu0 %950 }
 0xbab   : > { %1144 = vst.msk [vmem:[%s1902_s5 + $0x2] sm:$0x3] %vm467_vm5, %v951_v20 }
 0xbae   : > { %v958_v21 = vpop.permute.xlu0 %957 }
 0xbaf   : > { %1145 = vst.msk [vmem:[%s1903_s6 + $0x2] sm:$0x3] %vm467_vm5, %v958_v21 }
 0xbb0 PF: > { %s1154_s23 = sshll.u32 %s1475_s28, 7  ;;  %s981_s8 = sshll.u32 %s1552_s20, 4  ;;  %s1803_s8 = int_to_ptr.vmem [resolvable:$true] %s981_s8 }
 0xbb1   : > { %s1800_s7 = scalar_lea.hbm %s1900_s3, %s1154_s23  ;;  %s1924_s16 = sand.u32 1, %s1383_s25  }
 0xbb2   : > { %s1807_s15 = scalar_lea.sflag [#allocation5], %s1924_s16  ;;  %s1277_s9 = scalar_lea.vmem %s1803_s8, 128 }
 0xbb3   : > { %p1278_p7 = scmp.ne.s32.totalorder %s1803_s8, %s1277_s9  ;;  %s1401_s26 = smov [#allocation4]  }
 0xbb4   : > { %s1281_s13 = sshll.u32 %s1401_s26, 4  ;;  %s1282_s13 = int_to_ptr.vmem [resolvable:$false] %s1281_s13 }
 0xbb5   : > { %p1279_p8 = pnand %p1278_p7, %p1498_p5  ;;  %s1283_s10 = scalar_lea.vmem %s1282_s13, 256 }
 0xbb6   : > { %p1284_p10 = scmp.lt.s32.totalorder %s1803_s8, %s1282_s13  ;;  %p1285_p13 = scmp.lt.s32.totalorder %s1283_s10, %s1277_s9 }
 0xbb7   : > { %p1280_p9 = pneg %p1279_p8 }
 0xbb8   : > { %p1286_p0 = por %p1285_p13, %p1284_p10 }
 0xbba   : > { %p1287_p1 = pnand %p1286_p0, %p1280_p9 }
 0xbbc   : > { %1290 = shalt.err (!%p1287_p1)
}
 0xbbd   : > { %s1291_s20 = scalar_lea.hbm %s1800_s7, 128  ;;  %s1295_s16 = scalar_lea.hbm %s1900_s3, 256 }
 0xbbe   : > { %p1292_p2 = scmp.ne.s32.totalorder %s1800_s7, %s1291_s20  ;;  %p1296_p7 = scmp.lt.s32.totalorder %s1800_s7, %s1900_s3 }
 0xbbf   : > { %p1297_p8 = scmp.lt.s32.totalorder %s1295_s16, %s1291_s20 }
 0xbc0   : > { %p1293_p3 = pnand %p1292_p2, %p1498_p5 }
 0xbc1   : > { %p1298_p9 = por %p1297_p8, %p1296_p7 }
 0xbc2   : > { %p1294_p4 = pneg %p1293_p3 }
 0xbc4   : > { %p1299_p10 = pnand %p1298_p9, %p1294_p4 }
 0xbc6   : > { %1302 = shalt.err (!%p1299_p10)
}
 0xbc7   : > { %s1402_s13 = smov 2   ;;  %s1925_s9 = smov 32  }
 0xbc8   : > { %1156 = dma.vmem_to_hbm [thread:$0]  (%p1498_p5), %s1803_s8, 128, %s1800_s7, %s1807_s15, %s1925_s9, %s1925_s9, %s1402_s13  }
 0xbc9   : > { %s1926_s14 = ssub.s32 1, %s1475_s28  ;;  %s998_s16 = sshll.u32 %s1554_s29, 4  ;;  %s1841_s16 = int_to_ptr.vmem [resolvable:$true] %s998_s16 }
 0xbca   : > { %s1155_s10 = sshll.u32 %s1926_s14, 7  ;;  %s1927_s11 = sand.u32 1, %s1371_s22  }
 0xbcb   : > { %s1838_s17 = scalar_lea.hbm %s1901_s4, %s1155_s10  ;;  %s968_s26 = scalar_lea.sflag [#allocation7], %s1927_s11 }
 0xbcc   : > { %s1303_s0 = scalar_lea.vmem %s1841_s16, 128  ;;  %s1403_s28 = smov [#allocation6]  }
 0xbcd   : > { %p1304_p13 = scmp.ne.s32.totalorder %s1841_s16, %s1303_s0  ;;  %s1307_s7 = sshll.u32 %s1403_s28, 4  ;;  %s1308_s7 = int_to_ptr.vmem [resolvable:$false] %s1307_s7 }
 0xbce   : > { %s1309_s8 = scalar_lea.vmem %s1308_s7, 256  ;;  %p1310_p1 = scmp.lt.s32.totalorder %s1841_s16, %s1308_s7 }
 0xbcf   : > { %p1305_p0 = pnand %p1304_p13, %p1521_p11  ;;  %p1311_p2 = scmp.lt.s32.totalorder %s1309_s8, %s1303_s0 }
 0xbd1   : > { %p1306_p5 = pneg %p1305_p0  ;;  %p1312_p3 = por %p1311_p2, %p1310_p1 }
 0xbd3   : > { %p1313_p4 = pnand %p1312_p3, %p1306_p5 }
 0xbd5   : > { %1316 = shalt.err (!%p1313_p4)
}
 0xbd6   : > { %s1317_s29 = scalar_lea.hbm %s1838_s17, 128  ;;  %s1321_s10 = scalar_lea.hbm %s1901_s4, 256 }
 0xbd7   : > { %p1318_p7 = scmp.ne.s32.totalorder %s1838_s17, %s1317_s29  ;;  %p1322_p10 = scmp.lt.s32.totalorder %s1838_s17, %s1901_s4 }
 0xbd8   : > { %p1323_p13 = scmp.lt.s32.totalorder %s1321_s10, %s1317_s29 }
 0xbd9   : > { %p1319_p8 = pnand %p1318_p7, %p1521_p11 }
 0xbda   : > { %p1324_p0 = por %p1323_p13, %p1322_p10 }
 0xbdb   : > { %p1320_p9 = pneg %p1319_p8 }
 0xbdd   : > { %p1325_p5 = pnand %p1324_p0, %p1320_p9 }
 0xbdf   : > { %1328 = shalt.err (!%p1325_p5)
}
 0xbe0   : > { %1157 = dma.vmem_to_hbm [thread:$0]  (%p1521_p11), %s1841_s16, 128, %s1838_s17, %s968_s26, %s1925_s9, %s1925_s9, %s1402_s13  }
 0xbe1 PF: > { %p1167_p1 = scmp.ge.s32.totalorder %s1391_s27, 2  ;;  %s1025_s0 = sand.u32 1, %s1379_s24  }
 0xbe2   : > { %s1026_s11 = scalar_lea.sflag [#allocation5], %s1025_s0 }
 0xbe3   : > { %p1161_p2 = pnand %p1167_p1, %p1504_p6 }
 0xbe5   : > { %p1162_p3 = pneg %p1161_p2 }
 0xbe7   : > { %1358 = dma.done.wait (%p1162_p3), %s1026_s11, 128  }
 0xbe8   : > { %1360 = vsyncadd (%p1162_p3), %s1026_s11, 4294967168  ;;  %s1034_s18 = sand.u32 1, %s1367_s21   ;;  %p1164_p4 = pnand %p1167_p1, %p1527_p12 }
 0xbe9   : > { %s1035_s28 = scalar_lea.sflag [#allocation7], %s1034_s18 }
 0xbea   : > { %p1165_p7 = pneg %p1164_p4 }
 0xbec   : > { %1362 = dma.done.wait (%p1165_p7), %s1035_s28, 128  }
 0xbed   : > { %1364 = vsyncadd (%p1165_p7), %s1035_s28, 4294967168  ;;  %s1928_s13 = sld [smem:[#allocation10_spill]]  ;;  %p20_p6 = scmp.ge.s32.totalorder %s1479_s30, 4  }
 0xbee   : > { %s1929_s23 = sld [smem:[#allocation13_spill]]  ;;  %s1932_s21 = smov %s1371_s22 }
 0xbef   : > { %s1930_s27 = sld [smem:[#allocation11_spill]]  ;;  %s1934_s24 = smov %s1383_s25 }
 0xbf0   : > { %s1931_s26 = sld [smem:[#allocation12_spill]] }
 0xbf1   :  { %22 = sbr.rel (!%p20_p6) target bundleno = 9 (0x9), region = 125 }
 0xbf3   : > { %s1933_s22 = smov %s1928_s13 }
 0xbf5   : > { %s1935_s25 = smov %s1930_s27  ;;  %s1936_s27 = smov %s1479_s30 }
 0xbf6   :  { %1040 = vsyncpa [#allocation5], 1 }
 0xbf7   :  { %1042 = vsyncpa [#allocation5 + $0x1], 1 }
 0xbf8   :  { %1043 = vsyncpa [#allocation7], 1 }
 0xbf9   :  { %1045 = vsyncpa [#allocation7 + $0x1], 1 }

</bundles_post_ra>
